<compile_context>
chip_gen: v7x
topology: tpu7x:2x2x1
jax: 0.10.0
libtpu: 0.0.40
codegen_flags: <defaults>
</compile_context>

<pallas_src>
import functools
import math

import jax
import jax.numpy as jnp
from jax import lax
from jax.experimental import pallas as pl
from jax.experimental.pallas import tpu as pltpu

_DEG2RAD = math.pi / 180.0
_LANES = 3 * 128          # lane width of the 2-D interleaved view (whole triplets)


def _cdiv(a: int, b: int) -> int:
    return -(-a // b)


def _sincos(t, *, degrees: bool):
    """Return (cos(t), sin(t)) via a shared quadrant fold + minimax polynomials.

    Degrees path: the fold (t - 90*k) is exact, only the |remainder| <= 45 deg
    is converted to radians.  Radians path: 3-term Cody-Waite pi/2 reduction
    (intended for |t| within a few thousand radians, far beyond the module's
    documented [-180, 180] / [-90, 90] conventions).  Accuracy ~1e-7 absolute.
    """
    t = t.astype(jnp.float32)
    if degrees:
        k = jnp.floor(t * jnp.float32(1.0 / 90.0) + jnp.float32(0.5))
        r = (t - k * jnp.float32(90.0)) * jnp.float32(_DEG2RAD)
    else:
        k = jnp.floor(t * jnp.float32(2.0 / math.pi) + jnp.float32(0.5))
        # pi/2 = hi + mid + lo ; k*hi is exact for the small |k| seen here.
        r = t - k * jnp.float32(1.57073974609375)
        r = r - k * jnp.float32(5.657970905303955e-05)
        r = r - k * jnp.float32(9.920936294705029e-10)
    q = k.astype(jnp.int32) & 3
    r2 = r * r

    # cos(r) / sin(r) on r in [-pi/4, pi/4] (cephes single-precision minimax).
    cos_r = jnp.float32(2.443315711809948e-05) * r2 + jnp.float32(-1.388731625493765e-03)
    cos_r = cos_r * r2 + jnp.float32(4.166664568298827e-02)
    cos_r = cos_r * (r2 * r2) + (jnp.float32(1.0) - jnp.float32(0.5) * r2)

    sin_r = jnp.float32(-1.9515295891e-04) * r2 + jnp.float32(8.3321608736e-03)
    sin_r = sin_r * r2 + jnp.float32(-1.6666654611e-01)
    sin_r = sin_r * (r2 * r) + r

    q_odd = (q & 1) == 1
    cos_t = jnp.where(q_odd, sin_r, cos_r)
    sin_t = jnp.where(q_odd, cos_r, sin_r)
    cos_t = jnp.where(((q + 1) & 2) != 0, -cos_t, cos_t)   # negate for q in {1, 2}
    sin_t = jnp.where((q & 2) != 0, -sin_t, sin_t)          # negate for q in {2, 3}
    return cos_t, sin_t


def _spher2cart_kernel(x_ref, o_ref, *, degrees: bool):
    """Spherical -> Cartesian on an interleaved [r, phi, roh, r, phi, roh, ...] block.

    x_ref / o_ref: (row_tile, lanes) blocks with lanes % 3 == 0, so lane j holds
    coordinate (j % 3) of point (j // 3) within the row.  Output keeps the same
    interleaved layout: lane phase 0 -> x, 1 -> y, 2 -> z.
    """
    x = x_ref[...]
    lanes = x.shape[-1]

    # Lane phase masks, held on a single (1, lanes) row and broadcast by the VPU.
    lane = lax.broadcasted_iota(jnp.int32, (1, lanes), 1)
    phase = lane % 3
    is_x = phase == 0
    is_y = phase == 1
    is_z = phase == 2

    # Neighbour lanes via XLU rotations (out[j] = in[(j - shift) % lanes]).
    # lanes % 3 == 0 guarantees wrapped lanes are never selected below.
    fwd1 = pltpu.roll(x, lanes - 1, 1)   # fwd1[j] = x[j + 1]
    bwd1 = pltpu.roll(x, 1, 1)           # bwd1[j] = x[j - 1]
    bwd2 = pltpu.roll(x, 2, 1)           # bwd2[j] = x[j - 2]

    # Radius aligned with the output lane.
    r = jnp.where(is_x, x, jnp.where(is_y, bwd1, bwd2)).astype(jnp.float32)
    # Angle argument per lane: phi on x/y lanes, roh on z lanes.
    t = jnp.where(is_x, fwd1, x)

    cos_t, sin_t = _sincos(t, degrees=degrees)

    # factor1: cos(phi) | sin(phi) | sin(roh)
    f1 = jnp.where(is_x, cos_t, sin_t)
    # factor2: cos(roh) on x/y lanes -- rolled over from the z lane where it was
    # already computed -- and 1 on z lanes.
    cos_roh = jnp.where(is_x, pltpu.roll(cos_t, lanes - 2, 1),
                        pltpu.roll(cos_t, lanes - 1, 1))
    f2 = jnp.where(is_z, jnp.float32(1.0), cos_roh)

    o_ref[...] = (r * f1 * f2).astype(o_ref.dtype)


def _default_block_bytes() -> int:
    """Per-generation target block size (input stream) for the pipelined path."""
    try:
        kind = jax.devices()[0].device_kind.lower()
    except Exception:  # pragma: no cover - e.g. no devices during tracing tests
        kind = ""
    if "v5 lite" in kind or "v5e" in kind:
        return 1 << 20      # 2 streams x 2 buffers x 1 MiB = 4 MiB, v5e-friendly
    return 2 << 20          # v6e / v7x: 8 MiB double-buffered, < 32 MiB scoped VMEM


def _plan_tiling(n_elems: int, itemsize: int, *, block_bytes: int,
                 min_grid: int = 4, single_block_bytes: int = 2 << 20):
    """Return (rows, row_tile) for the (rows, 384) interleaved 2-D view."""
    sub = max(8, 32 // itemsize)            # sublane rows: 8 f32 / 16 bf16 / 32 int8
    row_bytes = _LANES * itemsize
    rows = _cdiv(n_elems, _LANES)
    if rows * row_bytes <= single_block_bytes:
        return rows, rows                    # tiny input: one block, one grid step
    row_tile = max(sub, (block_bytes // row_bytes) // sub * sub)
    if _cdiv(rows, row_tile) < min_grid:     # >= 2 pipelined steps per v7x core
        row_tile = max(sub, (_cdiv(rows, min_grid) // sub) * sub)
    return rows, min(row_tile, rows)


def spher2cart_pallas(batch: jax.Array, dim: int = -1, degrees: bool = True,
                      *, block_bytes: int | None = None) -> jax.Array:
    """Equivalent of Spher2Cart(dim=-1, degrees=...).forward(batch).

    batch: (batch, points, 3) spherical coords (r, phi, roh) along the last
    axis.  Returns (batch, points, 3) Cartesian coords (x, y, z).
    """
    # TODO(synk): support a non-last coordinate axis (would need a transpose).
    assert dim in (-1, batch.ndim - 1), "coordinate axis must be the last axis"
    assert batch.shape[-1] == 3, "expected (r, phi, roh) along the last axis"

    n = batch.size
    itemsize = batch.dtype.itemsize
    if block_bytes is None:
        block_bytes = _default_block_bytes()
    rows, row_tile = _plan_tiling(n, itemsize, block_bytes=block_bytes)

    # Metadata-only view: the coordinate axis is contiguous, so this reshape is
    # free.  Only shapes with (batch*points) % 128 != 0 pay a small flat pad.
    flat = batch.reshape(-1)
    n_pad = rows * _LANES - n
    if n_pad:
        flat = jnp.pad(flat, (0, n_pad))
    x2d = flat.reshape(rows, _LANES)

    spec = pl.BlockSpec((row_tile, _LANES), lambda i: (i, 0))
    out = pl.pallas_call(
        functools.partial(_spher2cart_kernel, degrees=degrees),
        out_shape=jax.ShapeDtypeStruct((rows, _LANES), batch.dtype),
        grid=(pl.cdiv(rows, row_tile),),
        in_specs=[spec],
        out_specs=spec,
        compiler_params=pltpu.CompilerParams(
            dimension_semantics=("parallel",),
            vmem_limit_bytes=32 << 20),
    )(x2d)

    out = out.reshape(-1)
    if n_pad:
        out = out[:n]
    return out.reshape(batch.shape)


def _spher2cart_ref(batch, degrees=True):
    r, phi, roh = batch[..., 0], batch[..., 1], batch[..., 2]
    if degrees:
        phi = jnp.deg2rad(phi)
        roh = jnp.deg2rad(roh)
    x = r * jnp.cos(phi) * jnp.cos(roh)
    y = r * jnp.sin(phi) * jnp.cos(roh)
    z = r * jnp.sin(roh)
    return jnp.stack([x, y, z], axis=-1)


def _make_batch(key, B, P):
    kr, kphi, kroh = jax.random.split(key, 3)
    r = jax.random.uniform(kr, (B, P), jnp.float32, 0.5, 50.0)
    phi = jax.random.uniform(kphi, (B, P), jnp.float32, -180.0, 180.0)
    roh = jax.random.uniform(kroh, (B, P), jnp.float32, -90.0, 90.0)
    return jnp.stack([r, phi, roh], axis=-1)          # (B, P, 3)


if __name__ == "__main__":
    key = jax.random.PRNGKey(0)

    # --- degrees path (B*P multiple of 128: fast, pad-free path) ---
    batch = _make_batch(key, 2, 4096)
    out = jax.block_until_ready(spher2cart_pallas(batch, dim=-1, degrees=True))
    ref = _spher2cart_ref(batch, degrees=True)
    assert out.shape == batch.shape and out.dtype == batch.dtype
    assert jnp.allclose(out, ref, atol=1e-4, rtol=1e-4), (
        float(jnp.max(jnp.abs(out - ref))))

    # --- radians path ---
    batch_rad = jnp.concatenate(
        [batch[..., :1], jnp.deg2rad(batch[..., 1:])], axis=-1)
    out_rad = jax.block_until_ready(
        spher2cart_pallas(batch_rad, dim=-1, degrees=False))
    assert jnp.allclose(out_rad, ref, atol=1e-4, rtol=1e-4), (
        float(jnp.max(jnp.abs(out_rad - ref))))

    # --- awkward point count (exercises the padded path instead of erroring) ---
    batch_odd = _make_batch(jax.random.PRNGKey(0), 2, 1000)
    out_odd = jax.block_until_ready(
        spher2cart_pallas(batch_odd, dim=-1, degrees=True))
    ref_odd = _spher2cart_ref(batch_odd, degrees=True)
    assert jnp.allclose(out_odd, ref_odd, atol=1e-4, rtol=1e-4), (
        float(jnp.max(jnp.abs(out_odd - ref_odd))))

    print("KERNEL_OK")
</pallas_src>

<mosaic_0001>
module attributes {stable_mosaic.version = 11 : i64} {
  func.func @_spher2cart_kernel(%arg0: i32, %arg1: memref<64x384xf32, #tpu.memory_space<vmem>>, %arg2: memref<64x384xf32, #tpu.memory_space<vmem>>) attributes {dimension_semantics = [#tpu.dimension_semantics<parallel>], iteration_bounds = array<i64: 1>, scalar_prefetch = 0 : i64, scratch_operands = 0 : i64, tpu.core_type = #tpu.core_type<tc>, window_params = [{transform_indices = @transform_0, window_bounds = array<i64: 64, 384>}, {transform_indices = @transform_1, window_bounds = array<i64: 64, 384>}]} {
    %c0 = arith.constant 0 : index
    %c0_0 = arith.constant 0 : index
    %0 = vector.load %arg1[%c0, %c0_0] : memref<64x384xf32, #tpu.memory_space<vmem>>, vector<64x384xf32>
    %1 = tpu.iota {dimensions = array<i32: 1>} : vector<1x384xi32>
    %c3_i32 = arith.constant 3 : i32
    %c0_i32 = arith.constant 0 : i32
    %2 = arith.cmpi eq, %c3_i32, %c0_i32 : i32
    %c1_i32 = arith.constant 1 : i32
    %3 = arith.select %2, %c1_i32, %c3_i32 : i32
    %4 = vector.broadcast %3 : i32 to vector<1x384xi32>
    %5 = arith.remsi %1, %4 : vector<1x384xi32>
    %c0_i32_1 = arith.constant 0 : i32
    %6 = vector.broadcast %c0_i32_1 : i32 to vector<1x384xi32>
    %7 = arith.cmpi ne, %5, %6 : vector<1x384xi32>
    %c0_i32_2 = arith.constant 0 : i32
    %8 = vector.broadcast %c0_i32_2 : i32 to vector<1x384xi32>
    %9 = arith.cmpi slt, %5, %8 : vector<1x384xi32>
    %c0_i32_3 = arith.constant 0 : i32
    %10 = arith.cmpi slt, %3, %c0_i32_3 : i32
    %11 = vector.broadcast %10 : i1 to vector<1x384xi1>
    %12 = vector.broadcast %11 : vector<1x384xi1> to vector<1x384xi1>
    %13 = arith.xori %9, %12 : vector<1x384xi1>
    %14 = arith.andi %13, %7 : vector<1x384xi1>
    %15 = vector.broadcast %3 : i32 to vector<1x384xi32>
    %16 = arith.addi %5, %15 : vector<1x384xi32>
    %17 = arith.select %14, %16, %5 : vector<1x384xi1>, vector<1x384xi32>
    %c0_i32_4 = arith.constant 0 : i32
    %18 = vector.broadcast %c0_i32_4 : i32 to vector<1x384xi32>
    %19 = arith.cmpi eq, %17, %18 : vector<1x384xi32>
    %c1_i32_5 = arith.constant 1 : i32
    %20 = vector.broadcast %c1_i32_5 : i32 to vector<1x384xi32>
    %21 = arith.cmpi eq, %17, %20 : vector<1x384xi32>
    %c2_i32 = arith.constant 2 : i32
    %22 = vector.broadcast %c2_i32 : i32 to vector<1x384xi32>
    %23 = arith.cmpi eq, %17, %22 : vector<1x384xi32>
    %c383_i32 = arith.constant 383 : i32
    %24 = tpu.dynamic_rotate %0 by %c383_i32 dim 1 : vector<64x384xf32>, i32 -> vector<64x384xf32>
    %c1_i32_6 = arith.constant 1 : i32
    %25 = tpu.dynamic_rotate %0 by %c1_i32_6 dim 1 : vector<64x384xf32>, i32 -> vector<64x384xf32>
    %c2_i32_7 = arith.constant 2 : i32
    %26 = tpu.dynamic_rotate %0 by %c2_i32_7 dim 1 : vector<64x384xf32>, i32 -> vector<64x384xf32>
    %27 = vector.shape_cast %21 : vector<1x384xi1> to vector<1x384xi1>
    %28 = vector.broadcast %27 : vector<1x384xi1> to vector<64x384xi1>
    %29 = arith.select %28, %25, %26 : vector<64x384xi1>, vector<64x384xf32>
    %30 = vector.shape_cast %19 : vector<1x384xi1> to vector<1x384xi1>
    %31 = vector.broadcast %30 : vector<1x384xi1> to vector<64x384xi1>
    %32 = arith.select %31, %0, %29 : vector<64x384xi1>, vector<64x384xf32>
    %33 = vector.shape_cast %19 : vector<1x384xi1> to vector<1x384xi1>
    %34 = vector.broadcast %33 : vector<1x384xi1> to vector<64x384xi1>
    %35 = arith.select %34, %24, %0 : vector<64x384xi1>, vector<64x384xf32>
    %cst = arith.constant 0.0111111114 : f32
    %36 = vector.broadcast %cst : f32 to vector<64x384xf32>
    %37 = arith.mulf %35, %36 : vector<64x384xf32>
    %cst_8 = arith.constant 5.000000e-01 : f32
    %38 = vector.broadcast %cst_8 : f32 to vector<64x384xf32>
    %39 = arith.addf %37, %38 : vector<64x384xf32>
    %40 = math.floor %39 : vector<64x384xf32>
    %cst_9 = arith.constant 9.000000e+01 : f32
    %41 = vector.broadcast %cst_9 : f32 to vector<64x384xf32>
    %42 = arith.mulf %40, %41 : vector<64x384xf32>
    %43 = arith.subf %35, %42 : vector<64x384xf32>
    %cst_10 = arith.constant 0.0174532924 : f32
    %44 = vector.broadcast %cst_10 : f32 to vector<64x384xf32>
    %45 = arith.mulf %43, %44 : vector<64x384xf32>
    %46 = arith.fptosi %40 : vector<64x384xf32> to vector<64x384xi32>
    %c3_i32_11 = arith.constant 3 : i32
    %47 = vector.broadcast %c3_i32_11 : i32 to vector<64x384xi32>
    %48 = arith.andi %46, %47 : vector<64x384xi32>
    %49 = arith.mulf %45, %45 : vector<64x384xf32>
    %cst_12 = arith.constant 2.44331568E-5 : f32
    %50 = vector.broadcast %cst_12 : f32 to vector<64x384xf32>
    %51 = arith.mulf %50, %49 : vector<64x384xf32>
    %cst_13 = arith.constant -0.00138873165 : f32
    %52 = vector.broadcast %cst_13 : f32 to vector<64x384xf32>
    %53 = arith.addf %51, %52 : vector<64x384xf32>
    %54 = arith.mulf %53, %49 : vector<64x384xf32>
    %cst_14 = arith.constant 0.0416666456 : f32
    %55 = vector.broadcast %cst_14 : f32 to vector<64x384xf32>
    %56 = arith.addf %54, %55 : vector<64x384xf32>
    %57 = arith.mulf %49, %49 : vector<64x384xf32>
    %58 = arith.mulf %56, %57 : vector<64x384xf32>
    %cst_15 = arith.constant 5.000000e-01 : f32
    %59 = vector.broadcast %cst_15 : f32 to vector<64x384xf32>
    %60 = arith.mulf %59, %49 : vector<64x384xf32>
    %cst_16 = arith.constant 1.000000e+00 : f32
    %61 = vector.broadcast %cst_16 : f32 to vector<64x384xf32>
    %62 = arith.subf %61, %60 : vector<64x384xf32>
    %63 = arith.addf %58, %62 : vector<64x384xf32>
    %cst_17 = arith.constant -1.95152956E-4 : f32
    %64 = vector.broadcast %cst_17 : f32 to vector<64x384xf32>
    %65 = arith.mulf %64, %49 : vector<64x384xf32>
    %cst_18 = arith.constant 0.00833216123 : f32
    %66 = vector.broadcast %cst_18 : f32 to vector<64x384xf32>
    %67 = arith.addf %65, %66 : vector<64x384xf32>
    %68 = arith.mulf %67, %49 : vector<64x384xf32>
    %cst_19 = arith.constant -0.166666552 : f32
    %69 = vector.broadcast %cst_19 : f32 to vector<64x384xf32>
    %70 = arith.addf %68, %69 : vector<64x384xf32>
    %71 = arith.mulf %49, %45 : vector<64x384xf32>
    %72 = arith.mulf %70, %71 : vector<64x384xf32>
    %73 = arith.addf %72, %45 : vector<64x384xf32>
    %c1_i32_20 = arith.constant 1 : i32
    %74 = vector.broadcast %c1_i32_20 : i32 to vector<64x384xi32>
    %75 = arith.andi %48, %74 : vector<64x384xi32>
    %c1_i32_21 = arith.constant 1 : i32
    %76 = vector.broadcast %c1_i32_21 : i32 to vector<64x384xi32>
    %77 = arith.cmpi eq, %75, %76 : vector<64x384xi32>
    %78 = arith.select %77, %73, %63 : vector<64x384xi1>, vector<64x384xf32>
    %79 = arith.select %77, %63, %73 : vector<64x384xi1>, vector<64x384xf32>
    %c1_i32_22 = arith.constant 1 : i32
    %80 = vector.broadcast %c1_i32_22 : i32 to vector<64x384xi32>
    %81 = arith.addi %48, %80 : vector<64x384xi32>
    %c2_i32_23 = arith.constant 2 : i32
    %82 = vector.broadcast %c2_i32_23 : i32 to vector<64x384xi32>
    %83 = arith.andi %81, %82 : vector<64x384xi32>
    %c0_i32_24 = arith.constant 0 : i32
    %84 = vector.broadcast %c0_i32_24 : i32 to vector<64x384xi32>
    %85 = arith.cmpi ne, %83, %84 : vector<64x384xi32>
    %cst_25 = arith.constant 0.000000e+00 : f32
    %86 = vector.broadcast %cst_25 : f32 to vector<64x384xf32>
    %87 = arith.subf %86, %78 : vector<64x384xf32>
    %88 = arith.select %85, %87, %78 : vector<64x384xi1>, vector<64x384xf32>
    %c2_i32_26 = arith.constant 2 : i32
    %89 = vector.broadcast %c2_i32_26 : i32 to vector<64x384xi32>
    %90 = arith.andi %48, %89 : vector<64x384xi32>
    %c0_i32_27 = arith.constant 0 : i32
    %91 = vector.broadcast %c0_i32_27 : i32 to vector<64x384xi32>
    %92 = arith.cmpi ne, %90, %91 : vector<64x384xi32>
    %cst_28 = arith.constant 0.000000e+00 : f32
    %93 = vector.broadcast %cst_28 : f32 to vector<64x384xf32>
    %94 = arith.subf %93, %79 : vector<64x384xf32>
    %95 = arith.select %92, %94, %79 : vector<64x384xi1>, vector<64x384xf32>
    %96 = vector.shape_cast %19 : vector<1x384xi1> to vector<1x384xi1>
    %97 = vector.broadcast %96 : vector<1x384xi1> to vector<64x384xi1>
    %98 = arith.select %97, %88, %95 : vector<64x384xi1>, vector<64x384xf32>
    %c382_i32 = arith.constant 382 : i32
    %99 = tpu.dynamic_rotate %88 by %c382_i32 dim 1 : vector<64x384xf32>, i32 -> vector<64x384xf32>
    %c383_i32_29 = arith.constant 383 : i32
    %100 = tpu.dynamic_rotate %88 by %c383_i32_29 dim 1 : vector<64x384xf32>, i32 -> vector<64x384xf32>
    %101 = vector.shape_cast %19 : vector<1x384xi1> to vector<1x384xi1>
    %102 = vector.broadcast %101 : vector<1x384xi1> to vector<64x384xi1>
    %103 = arith.select %102, %99, %100 : vector<64x384xi1>, vector<64x384xf32>
    %cst_30 = arith.constant 1.000000e+00 : f32
    %104 = vector.shape_cast %23 : vector<1x384xi1> to vector<1x384xi1>
    %105 = vector.broadcast %104 : vector<1x384xi1> to vector<64x384xi1>
    %106 = vector.broadcast %cst_30 : f32 to vector<64x384xf32>
    %107 = arith.select %105, %106, %103 : vector<64x384xi1>, vector<64x384xf32>
    %108 = arith.mulf %32, %98 : vector<64x384xf32>
    %109 = arith.mulf %108, %107 : vector<64x384xf32>
    %c0_31 = arith.constant 0 : index
    %c0_32 = arith.constant 0 : index
    %110 = vector.load %arg2[%c0_31, %c0_32] : memref<64x384xf32, #tpu.memory_space<vmem>>, vector<64x384xf32>
    tpu.vector_store %arg2[%c0_31, %c0_32], %109 {strides = array<i32>} : memref<64x384xf32, #tpu.memory_space<vmem>>, vector<64x384xf32>,
    return
  }
  func.func @transform_0(%arg0: i32) -> (i32, i32) {
    %c0_i32 = arith.constant 0 : i32
    %c0_i32_0 = arith.constant 0 : i32
    return %arg0, %c0_i32 : i32, i32
  }
  func.func @transform_1(%arg0: i32) -> (i32, i32) {
    %c0_i32 = arith.constant 0 : i32
    %c0_i32_0 = arith.constant 0 : i32
    return %arg0, %c0_i32 : i32, i32
  }
}

</mosaic_0001>

<bundles_post_ra>
// kernel: tpu_custom_call.1
= control target key start
LH: loop header
LB: loop body
LE: loop exit
PB: predicated region body
PF: predicated region fallthrough
CT: control target
= control target key end

     0   :  { %6 = vsyncpa [#allocation3], 0  ;;  %s4235_s0 = inlined_call_operand.hbm [shape: f32[64,384], index: 0, kind: input, shape index: {}]   ;;  %s4236_s1 = inlined_call_operand.hbm [shape: f32[64,384], index: 1, kind: output, shape index: {}]  }
   0x1   :  { %7 = vsyncpa [#allocation4], 0  ;;  %s1769_s6 = smov [#allocation2]   ;;  %s1721_s10 = scalar_lea.hbm %s4235_s0, 3072 }
   0x2   :  { %s13_s7 = sshll.u32 %s1769_s6, 4  ;;  %p1722_p0 = scmp.ne.s32.totalorder %s4235_s0, %s1721_s10  ;;  %s14_s7 = int_to_ptr.vmem [resolvable:$true] %s13_s7 }
   0x3   :  { %p1725_p1 = scmp.lt.u32.totalorder %s1721_s10, %s4235_s0 }
   0x5   :  { %p1727_p2 = pnand %p1725_p1, %p1722_p0 }
   0x7   :  { %1730 = shalt.err (!%p1727_p2)
}
   0x8   :  { %s1731_s15 = scalar_lea.vmem %s14_s7, 3072  ;;  %p1736_p4 = scmp.lt.s32.totalorder %s14_s7, %s14_s7 }
   0x9   :  { %p1732_p3 = scmp.ne.s32.totalorder %s14_s7, %s1731_s15  ;;  %p1737_p5 = scmp.lt.s32.totalorder %s1731_s15, %s1731_s15 }
   0xb   :  { %p1738_p6 = por %p1737_p5, %p1736_p4 }
   0xd   :  { %p1739_p7 = pnand %p1738_p6, %p1732_p3 }
   0xf   :  { %1742 = shalt.err (!%p1739_p7)
}
  0x10   :  { %s1770_s16 = smov 384   ;;  %s1771_s17 = smov 24  }
  0x11   :  { %19 = dma.hbm_to_vmem [thread:$0]  %s4235_s0, 3072, %s14_s7, [#allocation3], %s1770_s16, %s1770_s16, %s1771_s17  }
  0x12   :  { %1765 = dma.done.wait [#allocation3], 3072  }
  0x13   :  { %1766 = vsyncadd [#allocation3], 4294964224  ;;  %v1802_v0 = vld [vmem:[#allocation2 + $0x30] sm:$0xff]  ;;  %v1804_v1 = vld [vmem:[#allocation2] sm:$0xff]  ;;  %s1772_s20 = smov 127   ;;  %s1773_s0 = smov 1   ;;  %v47_v24 = vlaneseq }
  0x14   :  { %112 = vrot.lane.b32.xlu1 %v1802_v0, %s1772_s20  ;;  %108 = vrot.lane.b32.xlu0 %v1804_v1, %s1772_s20  ;;  %v1810_v2 = vld [vmem:[#allocation2 + $0x48] sm:$0xff]  ;;  %v1812_v3 = vld [vmem:[#allocation2 + $0x18] sm:$0xff]  ;;  %v1820_v5 = vld [vmem:[#allocation2 + $0x60] sm:$0xff]  ;;  %s1774_s21 = smov 2   ;;  %s1775_s22 = smov 126  }
  0x15   :  { %v1818_v4 = vld [vmem:[#allocation2 + $0x78] sm:$0xff]  ;;  %v1826_v6 = vld [vmem:[#allocation2 + $0xa8] sm:$0xff]  ;;  %v1828_v7 = vld [vmem:[#allocation2 + $0x90] sm:$0xff]  ;;  %v1926_v25 = vand.u32 127, %v47_v24  ;;  %s1776_s23 = smov [#allocation5]  }
  0x16   :  { %v1834_v8 = vld [vmem:[#allocation2 + $0x20] sm:$0xff]  ;;  %v1836_v9 = vld [vmem:[#allocation2 + $0x8] sm:$0xff]  ;;  %v1842_v10 = vld [vmem:[#allocation2 + $0x50] sm:$0xff]  ;;  %s1623_s24 = sshll.u32 %s1776_s23, 4  ;;  %s1624_s24 = int_to_ptr.vmem [resolvable:$true] %s1623_s24 }
  0x17   :  { %v1844_v11 = vld [vmem:[#allocation2 + $0x38] sm:$0xff]  ;;  %v1850_v12 = vld [vmem:[#allocation2 + $0x80] sm:$0xff]  ;;  %v1852_v13 = vld [vmem:[#allocation2 + $0x68] sm:$0xff]  ;;  %4325 = vst [vmem:[#allocation9_spill] sm:$0xff] %v1926_v25  ;;  %v1933_v26 = vmul.u32.u64.low 2863311531, %v1926_v25  ;;  %v1934_v27 = vmul.u32.u64.high 2863311531, %v1926_v25, %v1933_v26  ;;  %p1748_p9 = scmp.lt.s32.totalorder %s1624_s24, %s1624_s24 }
  0x18   :  { %114 = vrot.lane.b32.xlu1 %v1810_v2, %s1772_s20  ;;  %110 = vrot.lane.b32.xlu0 %v1812_v3, %s1772_s20  ;;  %v1858_v14 = vld [vmem:[#allocation2 + $0xb0] sm:$0xff]  ;;  %v1860_v15 = vld [vmem:[#allocation2 + $0x98] sm:$0xff]  ;;  %v1866_v16 = vld [vmem:[#allocation2 + $0x28] sm:$0xff]  ;;  %v49_v38 = vadd.s32 128, %v1926_v25  ;;  %v50_v39 = vadd.s32 256, %v1926_v25  ;;  %vm156_vm3 = vcmp.lt.s32.totalorder %v1926_v25, 127 }
  0x19   :  { %v1868_v17 = vld [vmem:[#allocation2 + $0x10] sm:$0xff]  ;;  %v1874_v18 = vld [vmem:[#allocation2 + $0x58] sm:$0xff]  ;;  %v1876_v19 = vld [vmem:[#allocation2 + $0x40] sm:$0xff]  ;;  %v57_v28 = vshrl.u32 %v1934_v27, 1  ;;  %s1743_s25 = scalar_lea.vmem %s1624_s24, 3072 }
  0x1a   :  { %v1882_v20 = vld [vmem:[#allocation2 + $0x88] sm:$0xff]  ;;  %v1884_v21 = vld [vmem:[#allocation2 + $0x70] sm:$0xff]  ;;  %v1890_v22 = vld [vmem:[#allocation2 + $0xb8] sm:$0xff]  ;;  %v1982_v43 = vmul.u32.u64.low 2863311531, %v49_v38  ;;  %v1983_v44 = vmul.u32.u64.high 2863311531, %v49_v38, %v1982_v43  ;;  %p1744_p8 = scmp.ne.s32.totalorder %s1624_s24, %s1743_s25  ;;  %p1749_p10 = scmp.lt.s32.totalorder %s1743_s25, %s1743_s25 }
  0x1b   :  { %v1892_v23 = vld [vmem:[#allocation2 + $0xa0] sm:$0xff]  ;;  %v58_v29 = vmul.u32 3, %v57_v28  ;;  %v1990_v45 = vmul.u32.u64.low 2863311531, %v50_v39  ;;  %v1991_v46 = vmul.u32.u64.high 2863311531, %v50_v39, %v1990_v45 }
  0x1c   :  { %118 = vrot.lane.b32.xlu1 %v1818_v4, %s1772_s20  ;;  %116 = vrot.lane.b32.xlu0 %v1820_v5, %s1772_s20  ;;  %4324 = vst [vmem:[#allocation8_spill] sm:$0xff] %v1892_v23  ;;  %v68_v53 = vshrl.u32 %v1983_v44, 1  ;;  %p1750_p11 = por %p1749_p10, %p1748_p9 }
  0x1d   :  { %v59_v32 = vsub.s32 %v1926_v25, %v58_v29  ;;  %v79_v57 = vshrl.u32 %v1991_v46, 1 }
  0x1e   :  { %v69_v59 = vmul.u32 3, %v68_v53  ;;  %p1751_p12 = pnand %p1750_p11, %p1744_p8 }
  0x1f   :  { %vm84_vm0 = vcmp.ne.s32.totalorder %v59_v32, 0  ;;  %vm87_vm1 = vcmp.lt.s32.totalorder %v59_v32, 0  ;;  %v93_v37 = vadd.s32 3, %v59_v32 }
  0x20   :  { %122 = vrot.lane.b32.xlu1 %v1826_v6, %s1772_s20  ;;  %120 = vrot.lane.b32.xlu0 %v1828_v7, %s1772_s20  ;;  %vm90_vm2 = vmand %vm87_vm1, %vm84_vm0  ;;  %v70_v24 = vsub.s32 %v49_v38, %v69_v59 }
  0x21   :  { %v1980_v42 = vsel %vm90_vm2, %v93_v37, %v59_v32 }
  0x22   :  { %4326 = vst [vmem:[#allocation10_spill] sm:$0xff] %v1980_v42  ;;  %vm99_vm4 = vcmp.eq.s32.totalorder %v1980_v42, 0  ;;  %vm85_vm5 = vcmp.ne.s32.totalorder %v70_v24, 0  ;;  %vm88_vm6 = vcmp.lt.s32.totalorder %v70_v24, 0 }
  0x23   :  { %vm91_vm9 = vmand %vm88_vm6, %vm85_vm5 }
  0x24   :  { %126 = vrot.lane.b32.xlu1 %v1834_v8, %s1772_s20  ;;  %124 = vrot.lane.b32.xlu0 %v1836_v9, %s1772_s20 }
  0x28   :  { %130 = vrot.lane.b32.xlu1 %v1842_v10, %s1772_s20  ;;  %128 = vrot.lane.b32.xlu0 %v1844_v11, %s1772_s20 }
  0x2c   :  { %134 = vrot.lane.b32.xlu1 %v1850_v12, %s1772_s20  ;;  %132 = vrot.lane.b32.xlu0 %v1852_v13, %s1772_s20 }
  0x30   :  { %138 = vrot.lane.b32.xlu1 %v1858_v14, %s1772_s20  ;;  %136 = vrot.lane.b32.xlu0 %v1860_v15, %s1772_s20 }
  0x34   :  { %142 = vrot.lane.b32.xlu1 %v1866_v16, %s1772_s20  ;;  %140 = vrot.lane.b32.xlu0 %v1868_v17, %s1772_s20 }
  0x38   :  { %146 = vrot.lane.b32.xlu1 %v1874_v18, %s1772_s20  ;;  %144 = vrot.lane.b32.xlu0 %v1876_v19, %s1772_s20 }
  0x3c   :  { %150 = vrot.lane.b32.xlu1 %v1882_v20, %s1772_s20  ;;  %148 = vrot.lane.b32.xlu0 %v1884_v21, %s1772_s20 }
  0x40   :  { %154 = vrot.lane.b32.xlu1 %v1890_v22, %s1772_s20  ;;  %152 = vrot.lane.b32.xlu0 %v1892_v23, %s1772_s20 }
  0x44   :  { %183 = vrot.lane.b32.xlu1 %v1812_v3, %s1773_s0  ;;  %181 = vrot.lane.b32.xlu0 %v1804_v1, %s1773_s0 }
  0x48   :  { %187 = vrot.lane.b32.xlu1 %v1810_v2, %s1773_s0  ;;  %185 = vrot.lane.b32.xlu0 %v1802_v0, %s1773_s0 }
  0x4c   :  { %191 = vrot.lane.b32.xlu1 %v1818_v4, %s1773_s0  ;;  %189 = vrot.lane.b32.xlu0 %v1820_v5, %s1773_s0 }
  0x50   :  { %195 = vrot.lane.b32.xlu1 %v1826_v6, %s1773_s0  ;;  %193 = vrot.lane.b32.xlu0 %v1828_v7, %s1773_s0 }
  0x54   :  { %199 = vrot.lane.b32.xlu1 %v1834_v8, %s1773_s0  ;;  %197 = vrot.lane.b32.xlu0 %v1836_v9, %s1773_s0 }
  0x58   :  { %203 = vrot.lane.b32.xlu1 %v1842_v10, %s1773_s0  ;;  %201 = vrot.lane.b32.xlu0 %v1844_v11, %s1773_s0 }
  0x5c   :  { %207 = vrot.lane.b32.xlu1 %v1850_v12, %s1773_s0  ;;  %205 = vrot.lane.b32.xlu0 %v1852_v13, %s1773_s0 }
  0x60   :  { %211 = vrot.lane.b32.xlu1 %v1858_v14, %s1773_s0  ;;  %209 = vrot.lane.b32.xlu0 %v1860_v15, %s1773_s0 }
  0x64   :  { %215 = vrot.lane.b32.xlu1 %v1866_v16, %s1773_s0  ;;  %213 = vrot.lane.b32.xlu0 %v1868_v17, %s1773_s0 }
  0x68   :  { %219 = vrot.lane.b32.xlu1 %v1874_v18, %s1773_s0  ;;  %217 = vrot.lane.b32.xlu0 %v1876_v19, %s1773_s0 }
  0x6c   :  { %223 = vrot.lane.b32.xlu1 %v1882_v20, %s1773_s0  ;;  %221 = vrot.lane.b32.xlu0 %v1884_v21, %s1773_s0 }
  0x70   :  { %227 = vrot.lane.b32.xlu1 %v1890_v22, %s1773_s0  ;;  %225 = vrot.lane.b32.xlu0 %v1892_v23, %s1773_s0 }
  0x74   :  { %256 = vrot.lane.b32.xlu1 %v1812_v3, %s1774_s21  ;;  %254 = vrot.lane.b32.xlu0 %v1804_v1, %s1774_s21 }
  0x78   :  { %260 = vrot.lane.b32.xlu1 %v1810_v2, %s1774_s21  ;;  %258 = vrot.lane.b32.xlu0 %v1802_v0, %s1774_s21 }
  0x7c   :  { %264 = vrot.lane.b32.xlu1 %v1818_v4, %s1774_s21  ;;  %262 = vrot.lane.b32.xlu0 %v1820_v5, %s1774_s21 }
  0x80   :  { %268 = vrot.lane.b32.xlu1 %v1826_v6, %s1774_s21  ;;  %266 = vrot.lane.b32.xlu0 %v1828_v7, %s1774_s21 }
  0x84   :  { %272 = vrot.lane.b32.xlu1 %v1834_v8, %s1774_s21  ;;  %270 = vrot.lane.b32.xlu0 %v1836_v9, %s1774_s21 }
  0x86   :  { %v1949_v30 = vpop.permute.xlu1 %112  ;;  %v1951_v31 = vpop.permute.xlu0 %108 }
  0x88   :  { %276 = vrot.lane.b32.xlu1 %v1842_v10, %s1774_s21  ;;  %274 = vrot.lane.b32.xlu0 %v1844_v11, %s1774_s21 }
  0x8a   :  { %v1958_v33 = vpop.permute.xlu1 %114  ;;  %v1960_v34 = vpop.permute.xlu0 %110 }
  0x8c   :  { %280 = vrot.lane.b32.xlu1 %v1850_v12, %s1774_s21  ;;  %278 = vrot.lane.b32.xlu0 %v1852_v13, %s1774_s21 }
  0x8e   :  { %v1966_v35 = vpop.permute.xlu1 %118  ;;  %v1968_v36 = vpop.permute.xlu0 %116 }
  0x90   :  { %284 = vrot.lane.b32.xlu1 %v1858_v14, %s1774_s21  ;;  %282 = vrot.lane.b32.xlu0 %v1860_v15, %s1774_s21 }
  0x92   :  { %v1976_v40 = vpop.permute.xlu1 %122  ;;  %v1978_v41 = vpop.permute.xlu0 %120 }
  0x94   :  { %288 = vrot.lane.b32.xlu1 %v1866_v16, %s1774_s21  ;;  %286 = vrot.lane.b32.xlu0 %v1868_v17, %s1774_s21 }
  0x96   :  { %v1994_v47 = vpop.permute.xlu1 %126  ;;  %v1996_v48 = vpop.permute.xlu0 %124 }
  0x97   :  { %v166_v49 = vsel %vm156_vm3, %v1960_v34, %v1994_v47  ;;  %v165_v50 = vsel %vm156_vm3, %v1951_v31, %v1996_v48 }
  0x98   :  { %v390_v51 = vsel %vm99_vm4, %v166_v49, %v1812_v3  ;;  %v387_v52 = vsel %vm99_vm4, %v165_v50, %v1804_v1  ;;  %292 = vrot.lane.b32.xlu1 %v1874_v18, %s1774_s21  ;;  %290 = vrot.lane.b32.xlu0 %v1876_v19, %s1774_s21  ;;  %v80_v1 = vmul.u32 3, %v79_v57  ;;  %v94_v49 = vadd.s32 3, %v70_v24 }
  0x99   :  { %v414_v54 = vmul.f32 0.011111111, %v390_v51  ;;  %v411_v55 = vmul.f32 0.011111111, %v387_v52 }
  0x9a   :  { %v2017_v56 = vpop.permute.xlu1 %130  ;;  %v2024_v58 = vpop.permute.xlu0 %128  ;;  %v81_v37 = vsub.s32 %v50_v39, %v80_v1 }
  0x9b   :  { %v438_v60 = vadd.f32 0.5, %v414_v54  ;;  %v435_v61 = vadd.f32 0.5, %v411_v55  ;;  %v168_v62 = vsel %vm156_vm3, %v1958_v33, %v2017_v56  ;;  %v167_v63 = vsel %vm156_vm3, %v1949_v30, %v2024_v58 }
  0x9c   :  { %296 = vrot.lane.b32.xlu1 %v1882_v20, %s1774_s21  ;;  %294 = vrot.lane.b32.xlu0 %v1884_v21, %s1774_s21  ;;  %v2043_v28 = vsel %vm99_vm4, %v168_v62, %v1810_v2  ;;  %v2048_v29 = vsel %vm99_vm4, %v167_v63, %v1802_v0  ;;  %vm86_vm7 = vcmp.ne.s32.totalorder %v81_v37, 0  ;;  %vm89_vm8 = vcmp.lt.s32.totalorder %v81_v37, 0 }
  0x9d   :  { %v462_v26 = vfloor.f32 %v438_v60  ;;  %v459_v27 = vfloor.f32 %v435_v61  ;;  %v420_v43 = vmul.f32 0.011111111, %v2043_v28  ;;  %v417_v44 = vmul.f32 0.011111111, %v2048_v29  ;;  %vm92_vm10 = vmand %vm89_vm8, %vm86_vm7 }
  0x9e   :  { %v2038_v3 = vpop.permute.xlu1 %134  ;;  %v2050_v32 = vpop.permute.xlu0 %132  ;;  %v95_v55 = vadd.s32 3, %v81_v37  ;;  %v2078_v62 = vsel %vm91_vm9, %v94_v49, %v70_v24 }
  0x9f   :  { %v170_v38 = vsel %vm156_vm3, %v1966_v35, %v2038_v3  ;;  %v486_v2 = vmul.f32 90.0, %v462_v26  ;;  %v483_v45 = vmul.f32 90.0, %v459_v27  ;;  %v169_v0 = vsel %vm156_vm3, %v1968_v36, %v2050_v32  ;;  %4327 = vst [vmem:[#allocation11_spill] sm:$0xff] %v2078_v62 }
  0xa0   :  { %300 = vrot.lane.b32.xlu1 %v1890_v22, %s1774_s21  ;;  %298 = vrot.lane.b32.xlu0 %v1892_v23, %s1774_s21  ;;  %v2067_v39 = vsel %vm99_vm4, %v170_v38, %v1818_v4  ;;  %v444_v50 = vadd.f32 0.5, %v420_v43  ;;  %v441_v53 = vadd.f32 0.5, %v417_v44  ;;  %v2072_v54 = vsel %vm99_vm4, %v169_v0, %v1820_v5 }
  0xa1   :  { %v510_v57 = vsub.f32 %v390_v51, %v486_v2  ;;  %v507_v59 = vsub.f32 %v387_v52, %v483_v45  ;;  %v426_v61 = vmul.f32 0.011111111, %v2067_v39  ;;  %v423_v4 = vmul.f32 0.011111111, %v2072_v54 }
  0xa2   :  { %v2062_v46 = vpop.permute.xlu1 %138  ;;  %v2074_v60 = vpop.permute.xlu0 %136  ;;  %v468_v63 = vfloor.f32 %v444_v50  ;;  %v465_v1 = vfloor.f32 %v441_v53  ;;  %v2084_v43 = vsel %vm92_vm10, %v95_v55, %v81_v37  ;;  %vm100_vm11 = vcmp.eq.s32.totalorder %v2078_v62, 0 }
  0xa3   :  { %v172_v5 = vsel %vm156_vm3, %v1976_v40, %v2062_v46  ;;  %v2086_v52 = vmul.f32 0.017453292, %v510_v57  ;;  %v2088_v44 = vmul.f32 0.017453292, %v507_v59  ;;  %v171_v24 = vsel %vm156_vm3, %v1978_v41, %v2074_v60 }
  0xa4   :  { %v450_v38 = vadd.f32 0.5, %v426_v61  ;;  %v447_v2 = vadd.f32 0.5, %v423_v4  ;;  %v2098_v45 = vsel %vm99_vm4, %v172_v5, %v1826_v6  ;;  %vm101_vm12 = vcmp.eq.s32.totalorder %v2084_v43, 0 }
  0xa5   :  { %4328 = vst [vmem:[#allocation12_spill] sm:$0xff] %v2088_v44  ;;  %v2104_v49 = vtrunc.f32 %v462_v26  ;;  %v492_v50 = vmul.f32 90.0, %v468_v63  ;;  %v489_v53 = vmul.f32 90.0, %v465_v1  ;;  %v2109_v55 = vsel %vm99_vm4, %v171_v24, %v1828_v7 }
  0xa6   :  { %v143_v51 = vpop.permute.xlu1 %142  ;;  %v141_v0 = vpop.permute.xlu0 %140  ;;  %v2113_v6 = vmul.f32 %v2086_v52, %v2086_v52  ;;  %v2115_v57 = vtrunc.f32 %v459_v27  ;;  %v2119_v59 = vmul.f32 %v2088_v44, %v2088_v44  ;;  %v474_v26 = vfloor.f32 %v450_v38 }
  0xa7   :  { %v158_v37 = vsel %vm156_vm3, %v1994_v47, %v143_v51  ;;  %v174_v47 = vsel %vm156_vm3, %v143_v51, %v1960_v34  ;;  %v432_v61 = vmul.f32 0.011111111, %v2098_v45  ;;  %v157_v27 = vsel %vm156_vm3, %v1996_v48, %v141_v0 }
  0xa8   :  { %v2128_v7 = vsel %vm100_vm11, %v158_v37, %v1834_v8  ;;  %v2133_v4 = vtrunc.f32 %v468_v63  ;;  %v471_v5 = vfloor.f32 %v447_v2  ;;  %v429_v24 = vmul.f32 0.011111111, %v2109_v55 }
  0xa9   :  { %v173_v34 = vsel %vm156_vm3, %v141_v0, %v1951_v31  ;;  %v516_v38 = vsub.f32 %v2043_v28, %v492_v50  ;;  %v513_v42 = vsub.f32 %v2048_v29, %v489_v53  ;;  %v2141_v8 = vtrunc.f32 %v465_v1 }
  0xaa   :  { %v147_v51 = vpop.permute.xlu1 %146  ;;  %v2146_v48 = vsel %vm101_vm12, %v174_v47, %v1866_v16  ;;  %v2150_v63 = vmul.f32 %v2113_v6, %v2086_v52  ;;  %v2154_v2 = vmul.f32 %v2119_v59, %v2088_v44  ;;  %v415_v31 = vmul.f32 0.011111111, %v2128_v7  ;;  %v145_v0 = vpop.permute.xlu0 %144 }
  0xab   :  { %4329 = vst [vmem:[#allocation13_spill] sm:$0xff] %v2141_v8  ;;  %v2160_v28 = vsel %vm100_vm11, %v157_v27, %v1836_v9  ;;  %v498_v29 = vmul.f32 90.0, %v474_v26  ;;  %v2162_v1 = vadd.f32 0.5, %v432_v61  ;;  %v2167_v16 = vsel %vm101_vm12, %v173_v34, %v1868_v17 }
  0xac   :  { %v160_v37 = vsel %vm156_vm3, %v2017_v56, %v147_v51  ;;  %v495_v50 = vmul.f32 90.0, %v471_v5  ;;  %v453_v53 = vadd.f32 0.5, %v429_v24  ;;  %v416_v47 = vmul.f32 0.011111111, %v2146_v48 }
  0xad   :  { %v176_v9 = vsel %vm156_vm3, %v147_v51, %v1958_v33  ;;  %v2176_v61 = vmul.f32 0.017453292, %v516_v38  ;;  %v2178_v27 = vmul.f32 0.017453292, %v513_v42  ;;  %v2180_v23 = vtrunc.f32 %v474_v26 }
  0xae   :  { %v412_v17 = vmul.f32 0.011111111, %v2160_v28  ;;  %v2183_v34 = vadd.f32 0.5, %v415_v31  ;;  %v413_v56 = vmul.f32 0.011111111, %v2167_v16  ;;  %v2189_v24 = vsel %vm100_vm11, %v160_v37, %v1842_v10  ;;  %v151_v31 = vpop.permute.xlu1 %150 }
  0xaf   :  { %4330 = vst [vmem:[#allocation14_spill] sm:$0xff] %v2176_v61  ;;  %4331 = vst [vmem:[#allocation15_spill] sm:$0xff] %v2178_v27  ;;  %v159_v33 = vsel %vm156_vm3, %v2024_v58, %v145_v0  ;;  %v522_v42 = vsub.f32 %v2067_v39, %v498_v29  ;;  %v480_v26 = vfloor.f32 %v2162_v1  ;;  %v2199_v51 = vsel %vm101_vm12, %v176_v9, %v1874_v18 }
  0xb0   :  { %4332 = vst [vmem:[#allocation16_spill] sm:$0xff] %v2180_v23  ;;  %v175_v38 = vsel %vm156_vm3, %v145_v0, %v1949_v30  ;;  %v519_v10 = vsub.f32 %v2072_v54, %v495_v50  ;;  %v2205_v37 = vtrunc.f32 %v471_v5  ;;  %v477_v23 = vfloor.f32 %v453_v53 }
  0xb1   :  { %v2207_v58 = vadd.f32 0.5, %v416_v47  ;;  %v2209_v39 = vadd.f32 0.5, %v412_v17  ;;  %v421_v29 = vmul.f32 0.011111111, %v2189_v24  ;;  %v2215_v18 = vsel %vm100_vm11, %v159_v33, %v1844_v11 }
  0xb2   :  { %4333 = vst [vmem:[#allocation17_spill] sm:$0xff] %v2205_v37  ;;  %v2220_v30 = vsel %vm101_vm12, %v175_v38, %v1876_v19  ;;  %v463_v54 = vfloor.f32 %v2183_v34  ;;  %v2223_v5 = vadd.f32 0.5, %v413_v56  ;;  %v422_v1 = vmul.f32 0.011111111, %v2199_v51 }
  0xb3   :  { %v162_v0 = vsel %vm156_vm3, %v2038_v3, %v151_v31  ;;  %v2231_v50 = vmul.f32 %v2176_v61, %v2176_v61  ;;  %v2235_v11 = vmul.f32 %v2178_v27, %v2178_v27  ;;  %v2237_v19 = vmul.f32 0.017453292, %v522_v42 }
  0xb4   :  { %v504_v53 = vmul.f32 90.0, %v480_v26  ;;  %v501_v47 = vmul.f32 90.0, %v477_v23  ;;  %v464_v9 = vfloor.f32 %v2207_v58  ;;  %v418_v17 = vmul.f32 0.011111111, %v2215_v18 }
  0xb5   :  { %4334 = vst [vmem:[#allocation18_spill] sm:$0xff] %v2235_v11  ;;  %v419_v34 = vmul.f32 0.011111111, %v2220_v30  ;;  %v2243_v56 = vadd.f32 0.5, %v421_v29  ;;  %v178_v33 = vsel %vm156_vm3, %v151_v31, %v1966_v35  ;;  %v2251_v42 = vsel %vm100_vm11, %v162_v0, %v1850_v12 }
  0xb6   :  { %v2253_v38 = vmul.f32 0.017453292, %v519_v10  ;;  %v487_v58 = vmul.f32 90.0, %v463_v54  ;;  %v2256_v8 = vadd.f32 0.5, %v422_v1  ;;  %v2260_v29 = vmul.f32 %v2231_v50, %v2176_v61 }
  0xb7   :  { %v2264_v3 = vmul.f32 %v2235_v11, %v2178_v27  ;;  %v528_v35 = vsub.f32 %v2098_v45, %v504_v53  ;;  %v427_v12 = vmul.f32 0.011111111, %v2251_v42  ;;  %v488_v31 = vmul.f32 90.0, %v464_v9 }
  0xb8   :  { %4335 = vst [vmem:[#allocation19_spill] sm:$0xff] %v2253_v38  ;;  %4336 = vst [vmem:[#allocation20_spill] sm:$0xff] %v2260_v29  ;;  %v2268_v10 = vadd.f32 0.5, %v418_v17  ;;  %v2270_v0 = vadd.f32 0.5, %v419_v34  ;;  %v2275_v1 = vsel %vm101_vm12, %v178_v33, %v1882_v20  ;;  %v2279_v37 = vmul.f32 %v2237_v19, %v2237_v19 }
  0xb9   :  { %4337 = vst [vmem:[#allocation21_spill] sm:$0xff] %v2264_v3  ;;  %v525_v27 = vsub.f32 %v2109_v55, %v501_v47  ;;  %v4338_v45 = vfloor.f32 %v2209_v39  ;;  %v469_v3 = vfloor.f32 %v2243_v56  ;;  %v2287_v17 = vmul.f32 %v2253_v38, %v2253_v38 }
  0xba   :  { %v511_v34 = vsub.f32 %v2128_v7, %v487_v58  ;;  %v4339_v20 = vfloor.f32 %v2223_v5  ;;  %v2293_v29 = vtrunc.f32 %v480_v26  ;;  %v2295_v11 = vtrunc.f32 %v477_v23  ;;  %v149_v58 = vpop.permute.xlu0 %148 }
  0xbb   :  { %v484_v53 = vmul.f32 90.0, %v4338_v45  ;;  %v428_v55 = vmul.f32 0.011111111, %v2275_v1  ;;  %v2298_v47 = vadd.f32 0.5, %v427_v12  ;;  %v2300_v56 = vmul.f32 0.017453292, %v528_v35 }
  0xbc   :  { %v485_v33 = vmul.f32 90.0, %v4339_v20  ;;  %4340 = vst [vmem:[#allocation22_spill] sm:$0xff] %v2295_v11  ;;  %v512_v45 = vsub.f32 %v2146_v48, %v488_v31  ;;  %v2307_v20 = vmul.f32 %v2279_v37, %v2237_v19  ;;  %v2309_v26 = vmul.f32 0.017453292, %v525_v27 }
  0xbd   :  { %4341 = vst [vmem:[#allocation23_spill] sm:$0xff] %v2300_v56  ;;  %v508_v23 = vsub.f32 %v2160_v28, %v484_v53  ;;  %v493_v61 = vmul.f32 90.0, %v469_v3  ;;  %v2314_v35 = vmul.f32 %v2287_v17, %v2253_v38  ;;  %v2316_v12 = vmul.f32 0.017453292, %v511_v34 }
  0xbe   :  { %4342 = vst [vmem:[#allocation24_spill] sm:$0xff] %v2309_v26  ;;  %v509_v48 = vsub.f32 %v2167_v16, %v485_v33  ;;  %v4344_v31 = vfloor.f32 %v2256_v8  ;;  %v2321_v44 = vadd.f32 0.5, %v428_v55  ;;  %v475_v11 = vfloor.f32 %v2298_v47 }
  0xbf   :  { %4343 = vst [vmem:[#allocation25_spill] sm:$0xff] %v2316_v12  ;;  %v161_v28 = vsel %vm156_vm3, %v2050_v32, %v149_v58  ;;  %v177_v27 = vsel %vm156_vm3, %v149_v58, %v1968_v36  ;;  %v2332_v53 = vmul.f32 %v2300_v56, %v2300_v56  ;;  %v2334_v16 = vmul.f32 0.017453292, %v512_v45 }
  0xc0   :  { %v494_v7 = vmul.f32 90.0, %v4344_v31  ;;  %v4346_v34 = vfloor.f32 %v2268_v10  ;;  %v4347_v55 = vfloor.f32 %v2270_v0  ;;  %v2342_v31 = vmul.f32 %v2309_v26, %v2309_v26 }
  0xc1   :  { %4345 = vst [vmem:[#allocation26_spill] sm:$0xff] %v2334_v16  ;;  %v2344_v32 = vtrunc.f32 %v463_v54  ;;  %v2346_v38 = vmul.f32 0.017453292, %v508_v23  ;;  %v517_v36 = vsub.f32 %v2189_v24, %v493_v61  ;;  %v2349_v58 = vmul.f32 0.017453292, %v509_v48 }
  0xc2   :  { %v490_v33 = vmul.f32 90.0, %v4346_v34  ;;  %v491_v47 = vmul.f32 90.0, %v4347_v55  ;;  %v518_v45 = vsub.f32 %v2199_v51, %v494_v7  ;;  %v2355_v34 = vsel %vm100_vm11, %v161_v28, %v1852_v13 }
  0xc3   :  { %4348 = vst [vmem:[#allocation27_spill] sm:$0xff] %v2344_v32  ;;  %4349 = vst [vmem:[#allocation28_spill] sm:$0xff] %v2349_v58  ;;  %v2360_v55 = vsel %vm101_vm12, %v177_v27, %v1884_v21  ;;  %v2362_v54 = vtrunc.f32 %v464_v9  ;;  %v2366_v23 = vmul.f32 %v2316_v12, %v2316_v12  ;;  %v476_v61 = vfloor.f32 %v2321_v44 }
  0xc4   :  { %v499_v24 = vmul.f32 90.0, %v475_v11  ;;  %v2371_v51 = vmul.f32 %v2332_v53, %v2300_v56  ;;  %v2375_v13 = vmul.f32 %v2334_v16, %v2334_v16  ;;  %v514_v21 = vsub.f32 %v2215_v18, %v490_v33  ;;  %v155_v33 = vpop.permute.xlu1 %154 }
  0xc5   :  { %4350 = vst [vmem:[#allocation29_spill] sm:$0xff] %v2362_v54  ;;  %v515_v9 = vsub.f32 %v2220_v30, %v491_v47  ;;  %v2381_v7 = vmul.f32 %v2342_v31, %v2309_v26  ;;  %v2383_v48 = vmul.f32 0.017453292, %v517_v36  ;;  %v424_v44 = vmul.f32 0.011111111, %v2355_v34 }
  0xc6   :  { %4351 = vst [vmem:[#allocation30_spill] sm:$0xff] %v2375_v13  ;;  %v425_v28 = vmul.f32 0.011111111, %v2360_v55  ;;  %v4353_v27 = vfloor.f32 %v2209_v39  ;;  %v2393_v32 = vmul.f32 %v2346_v38, %v2346_v38  ;;  %v2397_v18 = vmul.f32 %v2349_v58, %v2349_v58 }
  0xc7   :  { %4352 = vst [vmem:[#allocation31_spill] sm:$0xff] %v2381_v7  ;;  %v2399_v30 = vmul.f32 0.017453292, %v518_v45  ;;  %v2403_v47 = vmul.f32 %v2366_v23, %v2316_v12  ;;  %v4357_v36 = vfloor.f32 %v2223_v5  ;;  %v2412_v26 = vmul.f32 %v2375_v13, %v2334_v16 }
  0xc8   :  { %v2389_v54 = vtrunc.f32 %v4353_v27  ;;  %4355 = vst [vmem:[#allocation33_spill] sm:$0xff] %v2397_v18  ;;  %v500_v27 = vmul.f32 90.0, %v476_v61  ;;  %v2414_v7 = vtrunc.f32 %v469_v3  ;;  %v2416_v45 = vmul.f32 0.017453292, %v514_v21 }
  0xc9   :  { %4356 = vst [vmem:[#allocation34_spill] sm:$0xff] %v2399_v30  ;;  %v2407_v39 = vtrunc.f32 %v4357_v36  ;;  %4359 = vst [vmem:[#allocation36_spill] sm:$0xff] %v2412_v26  ;;  %v2418_v56 = vmul.f32 0.017453292, %v515_v9  ;;  %v2422_v12 = vmul.f32 %v2383_v48, %v2383_v48  ;;  %v448_v5 = vadd.f32 0.5, %v424_v44 }
  0xca   :  { %4354 = vst [vmem:[#allocation32_spill] sm:$0xff] %v2389_v54  ;;  %v523_v54 = vsub.f32 %v2251_v42, %v499_v24  ;;  %v449_v36 = vadd.f32 0.5, %v425_v28  ;;  %v164_v42 = vsel %vm156_vm3, %v2062_v46, %v155_v33  ;;  %v2429_v24 = vmul.f32 %v2393_v32, %v2346_v38 }
  0xcb   :  { %4358 = vst [vmem:[#allocation35_spill] sm:$0xff] %v2407_v39  ;;  %4360 = vst [vmem:[#allocation37_spill] sm:$0xff] %v2418_v56  ;;  %v2433_v3 = vmul.f32 %v2397_v18, %v2349_v58  ;;  %v4362_v21 = vfloor.f32 %v2256_v8  ;;  %v2441_v44 = vmul.f32 %v2399_v30, %v2399_v30  ;;  %v524_v28 = vsub.f32 %v2275_v1, %v500_v27 }
  0xcc   :  { %v2444_v16 = vmul.f32 0.017453292, %v523_v54  ;;  %v180_v46 = vsel %vm156_vm3, %v155_v33, %v1976_v40  ;;  %v1648_v26 = vcvt.f32.s32 %v2104_v49  ;;  %v4366_v58 = vfloor.f32 %v2268_v10 }
  0xcd   :  { %4361 = vst [vmem:[#allocation38_spill] sm:$0xff] %v2433_v3  ;;  %v2437_v9 = vtrunc.f32 %v4362_v21  ;;  %4364 = vst [vmem:[#allocation40_spill] sm:$0xff] %v2441_v44  ;;  %v2456_v8 = vmul.f32 %v2416_v45, %v2416_v45  ;;  %v2460_v21 = vmul.f32 %v2418_v56, %v2418_v56  ;;  %v2465_v1 = vsel %vm100_vm11, %v164_v42, %v1858_v14  ;;  %v153_v42 = vpop.permute.xlu0 %152 }
  0xce   :  { %4365 = vst [vmem:[#allocation41_spill] sm:$0xff] %v2444_v16  ;;  %v2452_v3 = vtrunc.f32 %v4366_v58  ;;  %v2469_v40 = vmul.f32 %v2422_v12, %v2383_v48  ;;  %v4368_v49 = vfloor.f32 %v2270_v0  ;;  %v472_v58 = vfloor.f32 %v448_v5 }
  0xcf   :  { %4363 = vst [vmem:[#allocation39_spill] sm:$0xff] %v2437_v9  ;;  %4367 = vst [vmem:[#allocation42_spill] sm:$0xff] %v2460_v21  ;;  %v473_v54 = vfloor.f32 %v449_v36  ;;  %v2477_v33 = vmul.f32 %v2441_v44, %v2399_v30  ;;  %v2479_v27 = vtrunc.f32 %v475_v11  ;;  %v2484_v14 = vsel %vm101_vm12, %v180_v46, %v1890_v22 }
  0xd0   :  { %v2473_v10 = vtrunc.f32 %v4368_v49  ;;  %4371 = vst [vmem:[#allocation45_spill] sm:$0xff] %v2484_v14  ;;  %v630_v9 = vmul.f32 2.4433157e-05, %v2113_v6  ;;  %v2487_v18 = vmul.f32 0.017453292, %v524_v28  ;;  %v2491_v0 = vmul.f32 %v2444_v16, %v2444_v16 }
  0xd1   :  { %4370 = vst [vmem:[#allocation44_spill] sm:$0xff] %v2477_v33  ;;  %v433_v5 = vmul.f32 0.011111111, %v2465_v1  ;;  %v582_v36 = vand.u32 3, %v1648_v26  ;;  %v2496_v11 = vmul.f32 %v2456_v8, %v2416_v45  ;;  %v2500_v22 = vmul.f32 %v2460_v21, %v2418_v56 }
  0xd2   :  { %4369 = vst [vmem:[#allocation43_spill] sm:$0xff] %v2473_v10  ;;  %4372 = vst [vmem:[#allocation46_spill] sm:$0xff] %v2487_v18  ;;  %v2502_v46 = vtrunc.f32 %v476_v61  ;;  %v654_v49 = vadd.f32 -0.0013887316, %v630_v9  ;;  %v2504_v28 = vmul.f32 90.0, %v472_v58  ;;  %v2506_v30 = vmul.f32 90.0, %v473_v54 }
  0xd3   :  { %4373 = vst [vmem:[#allocation47_spill] sm:$0xff] %v2500_v22  ;;  %v434_v33 = vmul.f32 0.011111111, %v2484_v14  ;;  %v163_v26 = vsel %vm156_vm3, %v2074_v60, %v153_v42  ;;  %v2512_v10 = vtrunc.f32 %v472_v58  ;;  %v2514_v44 = vtrunc.f32 %v473_v54 }
  0xd4   :  { %4374 = vst [vmem:[#allocation48_spill] sm:$0xff] %v2502_v46  ;;  %v678_v56 = vmul.f32 %v654_v49, %v2113_v6  ;;  %v846_v61 = vmul.f32 -0.00019515296, %v2113_v6  ;;  %v2520_v9 = vmul.f32 %v2487_v18, %v2487_v18  ;;  %v2524_v22 = vmul.f32 %v2491_v0, %v2444_v16  ;;  %v4399_v16 = vld [vmem:[#allocation14_spill] sm:$0xff] }
  0xd5   :  { %4375 = vst [vmem:[#allocation49_spill] sm:$0xff] %v2514_v44  ;;  %v2526_v46 = vadd.f32 0.5, %v433_v5  ;;  %v1110_v21 = vadd.s32 1, %v582_v36  ;;  %v726_v58 = vmul.f32 %v2113_v6, %v2113_v6  ;;  %v774_v54 = vmul.f32 0.5, %v2113_v6 }
  0xd6   :  { %4376 = vst [vmem:[#allocation50_spill] sm:$0xff] %v2520_v9  ;;  %4377 = vst [vmem:[#allocation51_spill] sm:$0xff] %v2524_v22  ;;  %v702_v60 = vadd.f32 0.041666646, %v678_v56  ;;  %v870_v49 = vadd.f32 0.008332161, %v846_v61  ;;  %v1642_v9 = vcvt.f32.s32 %v2115_v57  ;;  %v2548_v57 = vsel %vm100_vm11, %v163_v26, %v1860_v15 }
  0xd7   :  { %v2531_v44 = vadd.f32 0.5, %v434_v33  ;;  %v1014_v14 = vand.u32 1, %v582_v36  ;;  %v1230_v39 = vand.u32 2, %v582_v36  ;;  %v627_v56 = vmul.f32 2.4433157e-05, %v2119_v59 }
  0xd8   :  { %v750_v13 = vmul.f32 %v726_v58, %v702_v60  ;;  %v894_v5 = vmul.f32 %v870_v49, %v2113_v6  ;;  %v2543_v33 = vsel %vm156_vm3, %v153_v42, %v1978_v41  ;;  %v1134_v61 = vand.u32 2, %v1110_v21 }
  0xd9   :  { %4378 = vst [vmem:[#allocation52_spill] sm:$0xff] %v2531_v44  ;;  %v579_v36 = vand.u32 3, %v1642_v9  ;;  %v798_v60 = vsub.f32 1.0, %v774_v54  ;;  %v651_v6 = vadd.f32 -0.0013887316, %v627_v56  ;;  %vm2550_vm13 = vcmp.eq.s32.totalorder %v1014_v14, 1 }
  0xda   :  { %v918_v58 = vadd.f32 -0.16666655, %v894_v5  ;;  %vm2554_vm14 = vcmp.ne.s32.totalorder %v1230_v39, 0  ;;  %v771_v41 = vmul.f32 0.5, %v2119_v59  ;;  %v843_v21 = vmul.f32 -0.00019515296, %v2119_v59 }
  0xdb   :  { %v822_v42 = vadd.f32 %v798_v60, %v750_v13  ;;  %v675_v15 = vmul.f32 %v651_v6, %v2119_v59  ;;  %v1660_v26 = vcvt.f32.s32 %v2133_v4  ;;  %vm2563_vm15 = vcmp.ne.s32.totalorder %v1134_v61, 0 }
  0xdc   :  { %v966_v9 = vmul.f32 %v2150_v63, %v918_v58  ;;  %v723_v39 = vmul.f32 %v2119_v59, %v2119_v59  ;;  %v867_v54 = vadd.f32 0.008332161, %v843_v21  ;;  %v1107_v5 = vadd.s32 1, %v579_v36 }
  0xdd   :  { %v699_v18 = vadd.f32 0.041666646, %v675_v15  ;;  %v1011_v62 = vand.u32 1, %v579_v36  ;;  %v636_v13 = vmul.f32 2.4433157e-05, %v2231_v50  ;;  %v795_v63 = vsub.f32 1.0, %v771_v41 }
  0xde   :  { %v990_v56 = vadd.f32 %v966_v9, %v2086_v52  ;;  %v891_v60 = vmul.f32 %v867_v54, %v2119_v59  ;;  %v1227_v58 = vand.u32 2, %v579_v36  ;;  %v2572_v4 = vand.u32 3, %v1660_v26 }
  0xdf   :  { %v747_v21 = vmul.f32 %v723_v39, %v699_v18  ;;  %v660_v25 = vadd.f32 -0.0013887316, %v636_v13  ;;  %v1131_v15 = vand.u32 2, %v1107_v5  ;;  %v780_v59 = vmul.f32 0.5, %v2231_v50  ;;  %v4391_v5 = vld [vmem:[#allocation13_spill] sm:$0xff] }
  0xe0   :  { %v1062_v61 = vsel %vm2550_vm13, %v990_v56, %v822_v42  ;;  %v1086_v6 = vsel %vm2550_vm13, %v822_v42, %v990_v56  ;;  %v915_v9 = vadd.f32 -0.16666655, %v891_v60  ;;  %v852_v36 = vmul.f32 -0.00019515296, %v2231_v50  ;;  %v4392_v60 = vld [vmem:[#allocation18_spill] sm:$0xff] }
  0xe1   :  { %v1182_v44 = vsub.f32 0.0, %v1062_v61  ;;  %v1278_v52 = vsub.f32 0.0, %v1086_v6  ;;  %v819_v22 = vadd.f32 %v795_v63, %v747_v21  ;;  %v684_v41 = vmul.f32 %v660_v25, %v2231_v50 }
  0xe2   :  { %v963_v18 = vmul.f32 %v2154_v2, %v915_v9  ;;  %v1020_v42 = vand.u32 1, %v2572_v4  ;;  %vm1035_vm0 = vcmp.eq.s32.totalorder %v1011_v62, 1  ;;  %v732_v39 = vmul.f32 %v2231_v50, %v2231_v50 }
  0xe3   :  { %v2583_v26 = vsel %vm2563_vm15, %v1182_v44, %v1062_v61  ;;  %v2587_v49 = vsel %vm2554_vm14, %v1278_v52, %v1086_v6  ;;  %v708_v25 = vadd.f32 0.041666646, %v684_v41  ;;  %v876_v14 = vadd.f32 0.008332161, %v852_v36  ;;  %v4386_v44 = vld [vmem:[#allocation12_spill] sm:$0xff] }
  0xe4   :  { %4385 = vst [vmem:[#allocation53_spill] sm:$0xff] %v2587_v49  ;;  %1349 = vrot.lane.b32.xlu1 %v2583_v26, %s1775_s22  ;;  %v987_v54 = vadd.f32 %v963_v18, %v4386_v44  ;;  %vm2596_vm1 = vcmp.ne.s32.totalorder %v1131_v15, 0  ;;  %vm2600_vm2 = vcmp.ne.s32.totalorder %v1227_v58, 0  ;;  %v1654_v56 = vcvt.f32.s32 %v4391_v5  ;;  %v4400_v49 = vld [vmem:[#allocation21_spill] sm:$0xff] }
  0xe5   :  { %v756_v13 = vmul.f32 %v732_v39, %v708_v25  ;;  %v804_v63 = vsub.f32 1.0, %v780_v59  ;;  %v900_v62 = vmul.f32 %v876_v14, %v2231_v50  ;;  %v633_v61 = vmul.f32 2.4433157e-05, %v4392_v60  ;;  %v4398_v14 = vld [vmem:[#allocation16_spill] sm:$0xff] }
  0xe6   :  { %v1059_v6 = vsel %vm1035_vm0, %v987_v54, %v819_v22  ;;  %v1083_v21 = vsel %vm1035_vm0, %v819_v22, %v987_v54  ;;  %vm2607_vm5 = vcmp.eq.s32.totalorder %v1020_v42, 1  ;;  %v1116_v9 = vadd.s32 1, %v2572_v4  ;;  %v4397_v42 = vld [vmem:[#allocation20_spill] sm:$0xff] }
  0xe7   :  { %v1179_v58 = vsub.f32 0.0, %v1059_v6  ;;  %v1275_v15 = vsub.f32 0.0, %v1083_v21  ;;  %v828_v41 = vadd.f32 %v804_v63, %v756_v13  ;;  %v924_v36 = vadd.f32 -0.16666655, %v900_v62 }
  0xe8   :  { %v585_v18 = vand.u32 3, %v1654_v56  ;;  %v657_v44 = vadd.f32 -0.0013887316, %v633_v61  ;;  %v777_v59 = vmul.f32 0.5, %v4392_v60  ;;  %v849_v50 = vmul.f32 -0.00019515296, %v4392_v60 }
  0xe9   :  { %v2616_v25 = vsel %vm2596_vm1, %v1179_v58, %v1059_v6  ;;  %v2620_v22 = vsel %vm2600_vm2, %v1275_v15, %v1083_v21  ;;  %v972_v39 = vmul.f32 %v4397_v42, %v924_v36  ;;  %v1672_v54 = vcvt.f32.s32 %v4398_v14 }
  0xea   :  { %4395 = vst [vmem:[#allocation12_spill] sm:$0xff] %v2616_v25  ;;  %4396 = vst [vmem:[#allocation13_spill] sm:$0xff] %v2620_v22  ;;  %1347 = vrot.lane.b32.xlu0 %v2616_v25, %s1775_s22  ;;  %v1140_v5 = vand.u32 2, %v1116_v9  ;;  %v1236_v56 = vand.u32 2, %v2572_v4  ;;  %v681_v13 = vmul.f32 %v657_v44, %v4392_v60  ;;  %v873_v63 = vadd.f32 0.008332161, %v849_v50 }
  0xeb   :  { %v996_v62 = vadd.f32 %v972_v39, %v4399_v16  ;;  %v729_v2 = vmul.f32 %v4392_v60, %v4392_v60  ;;  %v801_v61 = vsub.f32 1.0, %v777_v59  ;;  %v1113_v6 = vadd.s32 1, %v585_v18 }
  0xec   :  { %v705_v21 = vadd.f32 0.041666646, %v681_v13  ;;  %v897_v58 = vmul.f32 %v873_v63, %v4392_v60  ;;  %v1017_v15 = vand.u32 1, %v585_v18  ;;  %v642_v36 = vmul.f32 2.4433157e-05, %v2279_v37 }
  0xed   :  { %v1068_v9 = vsel %vm2607_vm5, %v996_v62, %v828_v41  ;;  %v1092_v4 = vsel %vm2607_vm5, %v828_v41, %v996_v62  ;;  %v1137_v44 = vand.u32 2, %v1113_v6  ;;  %v594_v50 = vand.u32 3, %v1672_v54 }
  0xee   :  { %v1188_v42 = vsub.f32 0.0, %v1068_v9  ;;  %v1284_v39 = vsub.f32 0.0, %v1092_v4  ;;  %v753_v14 = vmul.f32 %v729_v2, %v705_v21  ;;  %v921_v16 = vadd.f32 -0.16666655, %v897_v58 }
  0xef   :  { %vm1164_vm6 = vcmp.ne.s32.totalorder %v1140_v5, 0  ;;  %vm1260_vm7 = vcmp.ne.s32.totalorder %v1236_v56, 0  ;;  %v1233_v59 = vand.u32 2, %v585_v18  ;;  %v666_v13 = vadd.f32 -0.0013887316, %v642_v36  ;;  %v4402_v56 = vld [vmem:[#allocation15_spill] sm:$0xff] }
  0xf0   :  { %v2637_v60 = vsel %vm1164_vm6, %v1188_v42, %v1068_v9  ;;  %v2639_v63 = vsel %vm1260_vm7, %v1284_v39, %v1092_v4  ;;  %v825_v22 = vadd.f32 %v801_v61, %v753_v14  ;;  %v969_v25 = vmul.f32 %v4400_v49, %v921_v16  ;;  %v4405_v36 = vld [vmem:[#allocation17_spill] sm:$0xff] }
  0xf1   :  { %v4401_v52 = vsub.f32 %v2355_v34, %v2504_v28  ;;  %v481_v54 = vfloor.f32 %v2526_v46  ;;  %1353 = vrot.lane.b32.xlu1 %v2637_v60, %s1775_s22  ;;  %v690_v18 = vmul.f32 %v666_v13, %v2279_v37  ;;  %v858_v5 = vmul.f32 -0.00019515296, %v2279_v37 }
  0xf2   :  { %v993_v62 = vadd.f32 %v969_v25, %v4402_v56  ;;  %vm1041_vm8 = vcmp.eq.s32.totalorder %v1017_v15, 1  ;;  %vm2653_vm9 = vcmp.ne.s32.totalorder %v1137_v44, 0  ;;  %v1122_v49 = vadd.s32 1, %v594_v50  ;;  %v4407_v56 = vld [vmem:[#allocation8_spill] sm:$0xff] }
  0xf3   :  { %v2645_v41 = vmul.f32 0.017453292, %v4401_v52  ;;  %v714_v34 = vadd.f32 0.041666646, %v690_v18  ;;  %v738_v28 = vmul.f32 %v2279_v37, %v2279_v37  ;;  %v786_v61 = vmul.f32 0.5, %v2279_v37 }
  0xf4   :  { %v882_v6 = vadd.f32 0.008332161, %v858_v5  ;;  %v1065_v21 = vsel %vm1041_vm8, %v993_v62, %v825_v22  ;;  %v1089_v58 = vsel %vm1041_vm8, %v825_v22, %v993_v62  ;;  %vm1257_vm10 = vcmp.ne.s32.totalorder %v1233_v59, 0 }
  0xf5   :  { %v1666_v9 = vcvt.f32.s32 %v4405_v36  ;;  %v1185_v4 = vsub.f32 0.0, %v1065_v21  ;;  %v1281_v25 = vsub.f32 0.0, %v1089_v58  ;;  %v762_v15 = vmul.f32 %v738_v28, %v714_v34 }
  0xf6   :  { %v906_v44 = vmul.f32 %v882_v6, %v2279_v37  ;;  %v1026_v42 = vand.u32 1, %v594_v50  ;;  %v1146_v39 = vand.u32 2, %v1122_v49  ;;  %v1242_v14 = vand.u32 2, %v594_v50 }
  0xf7   :  { %v639_v16 = vmul.f32 2.4433157e-05, %v2287_v17  ;;  %v2665_v13 = vsel %vm2653_vm9, %v1185_v4, %v1065_v21  ;;  %v2667_v52 = vsel %vm1257_vm10, %v1281_v25, %v1089_v58  ;;  %v810_v22 = vsub.f32 1.0, %v786_v61 }
  0xf8   :  { %v930_v59 = vadd.f32 -0.16666655, %v906_v44  ;;  %v4406_v18 = vsub.f32 %v2360_v55, %v2506_v30  ;;  %v2678_v37 = vsel %vm101_vm12, %v2543_v33, %v4407_v56  ;;  %1351 = vrot.lane.b32.xlu0 %v2665_v13, %s1775_s22  ;;  %v591_v50 = vand.u32 3, %v1666_v9 }
  0xf9   :  { %v663_v62 = vadd.f32 -0.0013887316, %v639_v16  ;;  %v2683_v2 = vmul.f32 0.011111111, %v2548_v57  ;;  %v834_v49 = vadd.f32 %v810_v22, %v762_v15  ;;  %v855_v55 = vmul.f32 -0.00019515296, %v2287_v17 }
  0xfa   :  { %v2672_v5 = vmul.f32 0.017453292, %v4406_v18  ;;  %v978_v34 = vmul.f32 %v2307_v20, %v930_v59  ;;  %vm1050_vm13 = vcmp.eq.s32.totalorder %v1026_v42, 1  ;;  %vm2687_vm14 = vcmp.ne.s32.totalorder %v1146_v39, 0 }
  0xfb   :  { %vm2691_vm15 = vcmp.ne.s32.totalorder %v1242_v14, 0  ;;  %v687_v28 = vmul.f32 %v663_v62, %v2287_v17  ;;  %v735_v6 = vmul.f32 %v2287_v17, %v2287_v17  ;;  %v783_v20 = vmul.f32 0.5, %v2287_v17 }
  0xfc   :  { %v1002_v61 = vadd.f32 %v978_v34, %v2237_v19  ;;  %v879_v21 = vadd.f32 0.008332161, %v855_v55  ;;  %v1023_v36 = vand.u32 1, %v591_v50  ;;  %v1119_v9 = vadd.s32 1, %v591_v50 }
  0xfd   :  { %v711_v58 = vadd.f32 0.041666646, %v687_v28  ;;  %v648_v4 = vmul.f32 2.4433157e-05, %v2332_v53  ;;  %v1684_v42 = vcvt.f32.s32 %v2293_v29  ;;  %v807_v22 = vsub.f32 1.0, %v783_v20  ;;  %v4412_v20 = vld [vmem:[#allocation19_spill] sm:$0xff] }
  0xfe   :  { %v1074_v25 = vsel %vm1050_vm13, %v1002_v61, %v834_v49  ;;  %v1098_v15 = vsel %vm1050_vm13, %v834_v49, %v1002_v61  ;;  %v903_v44 = vmul.f32 %v879_v21, %v2287_v17  ;;  %v1239_v18 = vand.u32 2, %v591_v50 }
  0xff   :  { %v1194_v39 = vsub.f32 0.0, %v1074_v25  ;;  %v1290_v14 = vsub.f32 0.0, %v1098_v15  ;;  %v759_v19 = vmul.f32 %v735_v6, %v711_v58  ;;  %v672_v16 = vadd.f32 -0.0013887316, %v648_v4  ;;  %v4413_v4 = vld [vmem:[#allocation22_spill] sm:$0xff] }
 0x100   :  { %v927_v59 = vadd.f32 -0.16666655, %v903_v44  ;;  %v864_v56 = vmul.f32 -0.00019515296, %v2332_v53  ;;  %v792_v29 = vmul.f32 0.5, %v2332_v53  ;;  %v600_v55 = vand.u32 3, %v1684_v42 }
 0x101   :  { %v2706_v62 = vsel %vm2687_vm14, %v1194_v39, %v1074_v25  ;;  %v2710_v49 = vsel %vm2691_vm15, %v1290_v14, %v1098_v15  ;;  %v696_v17 = vmul.f32 %v672_v16, %v2332_v53  ;;  %v831_v34 = vadd.f32 %v807_v22, %v759_v19 }
 0x102   :  { %1357 = vrot.lane.b32.xlu1 %v2706_v62, %s1775_s22  ;;  %v975_v50 = vmul.f32 %v2314_v35, %v927_v59  ;;  %v888_v28 = vadd.f32 0.008332161, %v864_v56  ;;  %v2719_v30 = vmul.f32 90.0, %v481_v54  ;;  %v1143_v61 = vand.u32 2, %v1119_v9 }
 0x103   :  { %v720_v33 = vadd.f32 0.041666646, %v696_v17  ;;  %v744_v6 = vmul.f32 %v2332_v53, %v2332_v53  ;;  %v1678_v25 = vcvt.f32.s32 %v4413_v4  ;;  %v645_v15 = vmul.f32 2.4433157e-05, %v2342_v31 }
 0x104   :  { %v999_v21 = vadd.f32 %v975_v50, %v4412_v20  ;;  %v912_v58 = vmul.f32 %v888_v28, %v2332_v53  ;;  %vm1047_vm0 = vcmp.eq.s32.totalorder %v1023_v36, 1  ;;  %vm2727_vm1 = vcmp.ne.s32.totalorder %v1239_v18, 0  ;;  %v4416_v28 = vld [vmem:[#allocation23_spill] sm:$0xff] }
 0x105   :  { %v768_v44 = vmul.f32 %v744_v6, %v720_v33  ;;  %v816_v42 = vsub.f32 1.0, %v792_v29  ;;  %v1128_v19 = vadd.s32 1, %v600_v55  ;;  %vm1167_vm2 = vcmp.ne.s32.totalorder %v1143_v61, 0 }
 0x106   :  { %v1071_v9 = vsel %vm1047_vm0, %v999_v21, %v831_v34  ;;  %v1095_v39 = vsel %vm1047_vm0, %v831_v34, %v999_v21  ;;  %v936_v14 = vadd.f32 -0.16666655, %v912_v58  ;;  %v1032_v59 = vand.u32 1, %v600_v55 }
 0x107   :  { %v1191_v16 = vsub.f32 0.0, %v1071_v9  ;;  %v1287_v22 = vsub.f32 0.0, %v1095_v39  ;;  %v840_v53 = vadd.f32 %v816_v42, %v768_v44  ;;  %v597_v17 = vand.u32 3, %v1678_v25 }
 0x108   :  { %v984_v56 = vmul.f32 %v2371_v51, %v936_v14  ;;  %v669_v50 = vadd.f32 -0.0013887316, %v645_v15  ;;  %v2734_v36 = vtrunc.f32 %v481_v54  ;;  %v861_v34 = vmul.f32 -0.00019515296, %v2342_v31 }
 0x109   :  { %v2736_v18 = vsel %vm1167_vm2, %v1191_v16, %v1071_v9  ;;  %v2740_v29 = vsel %vm2727_vm1, %v1287_v22, %v1095_v39  ;;  %v1152_v51 = vand.u32 2, %v1128_v19  ;;  %v1248_v33 = vand.u32 2, %v600_v55 }
 0x10a   :  { %1355 = vrot.lane.b32.xlu0 %v2736_v18, %s1775_s22  ;;  %v1008_v61 = vadd.f32 %v984_v56, %v4416_v28  ;;  %v693_v6 = vmul.f32 %v669_v50, %v2342_v31  ;;  %vm1056_vm5 = vcmp.eq.s32.totalorder %v1032_v59, 1  ;;  %v741_v46 = vmul.f32 %v2342_v31, %v2342_v31  ;;  %v4418_v28 = vld [vmem:[#allocation31_spill] sm:$0xff] }
 0x10b   :  { %v789_v54 = vmul.f32 0.5, %v2342_v31  ;;  %v885_v20 = vadd.f32 0.008332161, %v861_v34  ;;  %v1125_v25 = vadd.s32 1, %v597_v17  ;;  %v2752_v15 = vmul.f32 %v2645_v41, %v2645_v41 }
 0x10c   :  { %v1080_v21 = vsel %vm1056_vm5, %v1008_v61, %v840_v53  ;;  %v1104_v58 = vsel %vm1056_vm5, %v840_v53, %v1008_v61  ;;  %v717_v4 = vadd.f32 0.041666646, %v693_v6  ;;  %vm1176_vm6 = vcmp.ne.s32.totalorder %v1152_v51, 0  ;;  %v4417_v53 = vld [vmem:[#allocation27_spill] sm:$0xff] }
 0x10d   :  { %v1200_v35 = vsub.f32 0.0, %v1080_v21  ;;  %v1296_v44 = vsub.f32 0.0, %v1104_v58  ;;  %v909_v55 = vmul.f32 %v885_v20, %v2342_v31  ;;  %vm1272_vm7 = vcmp.ne.s32.totalorder %v1248_v33, 0 }
 0x10e   :  { %v765_v42 = vmul.f32 %v741_v46, %v717_v4  ;;  %v1029_v9 = vand.u32 1, %v597_v17  ;;  %v813_v19 = vsub.f32 1.0, %v789_v54  ;;  %v1149_v22 = vand.u32 2, %v1125_v25  ;;  %v4419_v54 = vld [vmem:[#allocation24_spill] sm:$0xff]  ;;  %v4425_v25 = vld [vmem:[#allocation25_spill] sm:$0xff] }
 0x10f   :  { %v2755_v39 = vsel %vm1176_vm6, %v1200_v35, %v1080_v21  ;;  %v2757_v14 = vsel %vm1272_vm7, %v1296_v44, %v1104_v58  ;;  %v933_v16 = vadd.f32 -0.16666655, %v909_v55  ;;  %v1245_v59 = vand.u32 2, %v597_v17  ;;  %v4420_v21 = vld [vmem:[#allocation32_spill] sm:$0xff] }
 0x110   :  { %1361 = vrot.lane.b32.xlu1 %v2755_v39, %s1775_s22  ;;  %v1650_v56 = vcvt.f32.s32 %v4417_v53  ;;  %v631_v50 = vmul.f32 2.4433157e-05, %v2366_v23  ;;  %v2764_v31 = vadd.f32 0.5, %v2683_v2  ;;  %v837_v34 = vadd.f32 %v813_v19, %v765_v42 }
 0x111   :  { %v981_v61 = vmul.f32 %v4418_v28, %v933_v16  ;;  %v847_v51 = vmul.f32 -0.00019515296, %v2366_v23  ;;  %vm1053_vm8 = vcmp.eq.s32.totalorder %v1029_v9, 1  ;;  %v775_v46 = vmul.f32 0.5, %v2366_v23 }
 0x112   :  { %v583_v33 = vand.u32 3, %v1650_v56  ;;  %v655_v6 = vadd.f32 -0.0013887316, %v631_v50  ;;  %v1644_v58 = vcvt.f32.s32 %v4420_v21  ;;  %v628_v4 = vmul.f32 2.4433157e-05, %v2393_v32 }
 0x113   :  { %v1005_v20 = vadd.f32 %v981_v61, %v4419_v54  ;;  %v871_v17 = vadd.f32 0.008332161, %v847_v51  ;;  %vm2772_vm9 = vcmp.ne.s32.totalorder %v1149_v22, 0  ;;  %vm2776_vm10 = vcmp.ne.s32.totalorder %v1245_v59, 0 }
 0x114   :  { %v679_v35 = vmul.f32 %v655_v6, %v2366_v23  ;;  %v727_v44 = vmul.f32 %v2366_v23, %v2366_v23  ;;  %v1111_v19 = vadd.s32 1, %v583_v33  ;;  %v799_v56 = vsub.f32 1.0, %v775_v46 }
 0x115   :  { %v1077_v55 = vsel %vm1053_vm8, %v1005_v20, %v837_v34  ;;  %v1101_v42 = vsel %vm1053_vm8, %v837_v34, %v1005_v20  ;;  %v895_v9 = vmul.f32 %v871_v17, %v2366_v23  ;;  %v1015_v28 = vand.u32 1, %v583_v33 }
 0x116   :  { %v1197_v16 = vsub.f32 0.0, %v1077_v55  ;;  %v1293_v53 = vsub.f32 0.0, %v1101_v42  ;;  %v703_v22 = vadd.f32 0.041666646, %v679_v35  ;;  %v580_v59 = vand.u32 3, %v1644_v58 }
 0x117   :  { %v919_v50 = vadd.f32 -0.16666655, %v895_v9  ;;  %v652_v61 = vadd.f32 -0.0013887316, %v628_v4  ;;  %v1231_v54 = vand.u32 2, %v583_v33  ;;  %v529_v23 = vsub.f32 %v2465_v1, %v2719_v30 }
 0x118   :  { %v2786_v51 = vsel %vm2772_vm9, %v1197_v16, %v1077_v55  ;;  %v2790_v6 = vsel %vm2776_vm10, %v1293_v53, %v1101_v42  ;;  %v751_v34 = vmul.f32 %v727_v44, %v703_v22  ;;  %v1135_v20 = vand.u32 2, %v1111_v19 }
 0x119   :  { %1359 = vrot.lane.b32.xlu0 %v2786_v51, %s1775_s22  ;;  %v967_v46 = vmul.f32 %v2403_v47, %v919_v50  ;;  %v676_v17 = vmul.f32 %v652_v61, %v2393_v32  ;;  %v1686_v21 = vcvt.f32.s32 %v2734_v36  ;;  %v4273_v58 = vfloor.f32 %v2764_v31 }
 0x11a   :  { %v823_v4 = vadd.f32 %v799_v56, %v751_v34  ;;  %v844_v2 = vmul.f32 -0.00019515296, %v2393_v32  ;;  %v724_v44 = vmul.f32 %v2393_v32, %v2393_v32  ;;  %v1108_v55 = vadd.s32 1, %v580_v59 }
 0x11b   :  { %v991_v33 = vadd.f32 %v967_v46, %v4425_v25  ;;  %v700_v35 = vadd.f32 0.041666646, %v676_v17  ;;  %vm1039_vm13 = vcmp.eq.s32.totalorder %v1015_v28, 1  ;;  %vm2804_vm14 = vcmp.ne.s32.totalorder %v1231_v54, 0 }
 0x11c   :  { %v772_v42 = vmul.f32 0.5, %v2393_v32  ;;  %v868_v9 = vadd.f32 0.008332161, %v844_v2  ;;  %vm1159_vm15 = vcmp.ne.s32.totalorder %v1135_v20, 0  ;;  %v1012_v53 = vand.u32 1, %v580_v59 }
 0x11d   :  { %v1063_v19 = vsel %vm1039_vm13, %v991_v33, %v823_v4  ;;  %v1087_v16 = vsel %vm1039_vm13, %v823_v4, %v991_v33  ;;  %v748_v50 = vmul.f32 %v724_v44, %v700_v35  ;;  %v1132_v34 = vand.u32 2, %v1108_v55 }
 0x11e   :  { %v1183_v22 = vsub.f32 0.0, %v1063_v19  ;;  %v1279_v56 = vsub.f32 0.0, %v1087_v16  ;;  %v892_v61 = vmul.f32 %v868_v9, %v2393_v32  ;;  %v1228_v46 = vand.u32 2, %v580_v59 }
 0x11f   :  { %v1662_v28 = vcvt.f32.s32 %v2414_v7  ;;  %v637_v54 = vmul.f32 2.4433157e-05, %v2422_v12  ;;  %v796_v4 = vsub.f32 1.0, %v772_v42  ;;  %v2820_v25 = vmul.f32 90.0, %v4273_v58 }
 0x120   :  { %v2812_v17 = vsel %vm1159_vm15, %v1183_v22, %v1063_v19  ;;  %v2816_v2 = vsel %vm2804_vm14, %v1279_v56, %v1087_v16  ;;  %v916_v20 = vadd.f32 -0.16666655, %v892_v61  ;;  %v781_v7 = vmul.f32 0.5, %v2422_v12 }
 0x121   :  { %4428 = vst [vmem:[#allocation18_spill] sm:$0xff] %v2816_v2  ;;  %1365 = vrot.lane.b32.xlu1 %v2812_v17, %s1775_s22  ;;  %v589_v32 = vand.u32 3, %v1662_v28  ;;  %v661_v59 = vadd.f32 -0.0013887316, %v637_v54  ;;  %v820_v33 = vadd.f32 %v796_v4, %v748_v50  ;;  %v853_v44 = vmul.f32 -0.00019515296, %v2422_v12 }
 0x122   :  { %v964_v35 = vmul.f32 %v2429_v24, %v916_v20  ;;  %v634_v55 = vmul.f32 2.4433157e-05, %v2456_v8  ;;  %vm1036_vm0 = vcmp.eq.s32.totalorder %v1012_v53, 1  ;;  %vm2828_vm1 = vcmp.ne.s32.totalorder %v1132_v34, 0 }
 0x123   :  { %vm2832_vm2 = vcmp.ne.s32.totalorder %v1228_v46, 0  ;;  %v685_v9 = vmul.f32 %v661_v59, %v2422_v12  ;;  %v877_v16 = vadd.f32 0.008332161, %v853_v44  ;;  %v1117_v22 = vadd.s32 1, %v589_v32 }
 0x124   :  { %v988_v19 = vadd.f32 %v964_v35, %v2346_v38  ;;  %v1656_v24 = vcvt.f32.s32 %v2452_v3  ;;  %v733_v53 = vmul.f32 %v2422_v12, %v2422_v12  ;;  %v805_v50 = vsub.f32 1.0, %v781_v7 }
 0x125   :  { %v709_v56 = vadd.f32 0.041666646, %v685_v9  ;;  %v658_v61 = vadd.f32 -0.0013887316, %v634_v55  ;;  %v901_v46 = vmul.f32 %v877_v16, %v2422_v12  ;;  %v1021_v54 = vand.u32 1, %v589_v32 }
 0x126   :  { %v1060_v34 = vsel %vm1036_vm0, %v988_v19, %v820_v33  ;;  %v1084_v28 = vsel %vm1036_vm0, %v820_v33, %v988_v19  ;;  %v1237_v58 = vand.u32 2, %v589_v32  ;;  %v1141_v35 = vand.u32 2, %v1117_v22 }
 0x127   :  { %v1180_v4 = vsub.f32 0.0, %v1060_v34  ;;  %v1276_v20 = vsub.f32 0.0, %v1084_v28  ;;  %v757_v59 = vmul.f32 %v733_v53, %v709_v56  ;;  %v925_v38 = vadd.f32 -0.16666655, %v901_v46 }
 0x128   :  { %v586_v44 = vand.u32 3, %v1656_v24  ;;  %v682_v3 = vmul.f32 %v658_v61, %v2456_v8  ;;  %v730_v12 = vmul.f32 %v2456_v8, %v2456_v8  ;;  %v850_v33 = vmul.f32 -0.00019515296, %v2456_v8 }
 0x129   :  { %v2845_v9 = vsel %vm2828_vm1, %v1180_v4, %v1060_v34  ;;  %v2849_v7 = vsel %vm2832_vm2, %v1276_v20, %v1084_v28  ;;  %v829_v32 = vadd.f32 %v805_v50, %v757_v59  ;;  %v973_v55 = vmul.f32 %v2469_v40, %v925_v38 }
 0x12a   :  { %4433 = vst [vmem:[#allocation20_spill] sm:$0xff] %v2849_v7  ;;  %1363 = vrot.lane.b32.xlu0 %v2845_v9, %s1775_s22  ;;  %v706_v19 = vadd.f32 0.041666646, %v682_v3  ;;  %v778_v47 = vmul.f32 0.5, %v2456_v8  ;;  %v2860_v16 = vmul.f32 %v2752_v15, %v2645_v41  ;;  %v2865_v42 = vmul.f32 0.017453292, %v529_v23 }
 0x12b   :  { %v2869_v22 = vand.u32 3, %v1686_v21  ;;  %v874_v24 = vadd.f32 0.008332161, %v850_v33  ;;  %v526_v40 = vsub.f32 %v2548_v57, %v2820_v25  ;;  %v997_v56 = vadd.f32 %v973_v55, %v2383_v48 }
 0x12c   :  { %v754_v53 = vmul.f32 %v730_v12, %v706_v19  ;;  %v1114_v50 = vadd.s32 1, %v586_v44  ;;  %vm1045_vm5 = vcmp.eq.s32.totalorder %v1021_v54, 1  ;;  %vm1165_vm6 = vcmp.ne.s32.totalorder %v1141_v35, 0 }
 0x12d   :  { %vm1261_vm7 = vcmp.ne.s32.totalorder %v1237_v58, 0  ;;  %v898_v61 = vmul.f32 %v874_v24, %v2456_v8  ;;  %v1069_v1 = vsel %vm1045_vm5, %v997_v56, %v829_v32  ;;  %v1093_v30 = vsel %vm1045_vm5, %v829_v32, %v997_v56 }
 0x12e   :  { %v802_v23 = vsub.f32 1.0, %v778_v47  ;;  %v1018_v34 = vand.u32 1, %v586_v44  ;;  %v1189_v36 = vsub.f32 0.0, %v1069_v1  ;;  %v1285_v21 = vsub.f32 0.0, %v1093_v30 }
 0x12f   :  { %v922_v28 = vadd.f32 -0.16666655, %v898_v61  ;;  %v1674_v46 = vcvt.f32.s32 %v2479_v27  ;;  %v1138_v57 = vand.u32 2, %v1114_v50  ;;  %v1234_v25 = vand.u32 2, %v586_v44  ;;  %v2891_v44 = vpop.permute.xlu1 %183 }
 0x130   :  { %v826_v4 = vadd.f32 %v802_v23, %v754_v53  ;;  %v643_v48 = vmul.f32 2.4433157e-05, %v2491_v0  ;;  %v2877_v20 = vsel %vm1165_vm6, %v1189_v36, %v1069_v1  ;;  %v2879_v54 = vsel %vm1261_vm7, %v1285_v21, %v1093_v30 }
 0x131   :  { %4434 = vst [vmem:[#allocation16_spill] sm:$0xff] %v2879_v54  ;;  %v970_v8 = vmul.f32 %v2496_v11, %v922_v28  ;;  %v859_v58 = vmul.f32 -0.00019515296, %v2491_v0  ;;  %v2883_v59 = vmul.f32 0.017453292, %v526_v40  ;;  %v4435_v38 = vfloor.f32 %v2764_v31  ;;  %1369 = vrot.lane.b32.xlu1 %v2877_v20, %s1775_s22 }
 0x132   :  { %vm1042_vm8 = vcmp.eq.s32.totalorder %v1018_v34, 1  ;;  %v667_v27 = vadd.f32 -0.0013887316, %v643_v48  ;;  %v595_v12 = vand.u32 3, %v1674_v46  ;;  %v787_v11 = vmul.f32 0.5, %v2491_v0 }
 0x133   :  { %v2887_v35 = vtrunc.f32 %v4435_v38  ;;  %v994_v3 = vadd.f32 %v970_v8, %v2416_v45  ;;  %v883_v33 = vadd.f32 0.008332161, %v859_v58  ;;  %vm2895_vm9 = vcmp.ne.s32.totalorder %v1138_v57, 0  ;;  %v2917_v46 = vpop.permute.xlu1 %187 }
 0x134   :  { %vm2899_vm10 = vcmp.ne.s32.totalorder %v1234_v25, 0  ;;  %v691_v55 = vmul.f32 %v667_v27, %v2491_v0  ;;  %v640_v19 = vmul.f32 2.4433157e-05, %v2752_v15  ;;  %v1668_v40 = vcvt.f32.s32 %v2512_v10  ;;  %4441 = vst [vmem:[#allocation21_spill] sm:$0xff] %v2917_v46 }
 0x135   :  { %v1066_v47 = vsel %vm1042_vm8, %v994_v3, %v826_v4  ;;  %v1090_v24 = vsel %vm1042_vm8, %v826_v4, %v994_v3  ;;  %v907_v45 = vmul.f32 %v883_v33, %v2491_v0  ;;  %v739_v61 = vmul.f32 %v2491_v0, %v2491_v0  ;;  %v4442_v0 = vld [vmem:[#allocation51_spill] sm:$0xff]  ;;  %v2927_v3 = vpop.permute.xlu0 %181 }
 0x136   :  { %v1186_v56 = vsub.f32 0.0, %v1066_v47  ;;  %v1282_v53 = vsub.f32 0.0, %v1090_v24  ;;  %v715_v50 = vadd.f32 0.041666646, %v691_v55  ;;  %v811_v1 = vsub.f32 1.0, %v787_v11  ;;  %v4443_v11 = vld [vmem:[#allocation41_spill] sm:$0xff] }
 0x137   :  { %v931_v30 = vadd.f32 -0.16666655, %v907_v45  ;;  %v1123_v23 = vadd.s32 1, %v595_v12  ;;  %v664_v34 = vadd.f32 -0.0013887316, %v640_v19  ;;  %v1027_v10 = vand.u32 1, %v595_v12 }
 0x138   :  { %v2911_v36 = vsel %vm2895_vm9, %v1186_v56, %v1066_v47  ;;  %v2915_v21 = vsel %vm2899_vm10, %v1282_v53, %v1090_v24  ;;  %v763_v28 = vmul.f32 %v739_v61, %v715_v50  ;;  %v1243_v57 = vand.u32 2, %v595_v12  ;;  %v2938_v61 = vpop.permute.xlu1 %191 }
 0x139   :  { %4440 = vst [vmem:[#allocation14_spill] sm:$0xff] %v2915_v21  ;;  %1367 = vrot.lane.b32.xlu0 %v2911_v36, %s1775_s22  ;;  %v979_v4 = vmul.f32 %v4442_v0, %v931_v30  ;;  %v592_v25 = vand.u32 3, %v1668_v40  ;;  %v688_v48 = vmul.f32 %v664_v34, %v2752_v15  ;;  %v625_v8 = vmul.f32 %v2865_v42, %v2865_v42  ;;  %v4467_v21 = vld [vmem:[#allocation36_spill] sm:$0xff] }
 0x13a   :  { %v1680_v58 = vcvt.f32.s32 %v2887_v35  ;;  %v835_v38 = vadd.f32 %v811_v1, %v763_v28  ;;  %v856_v27 = vmul.f32 -0.00019515296, %v2752_v15  ;;  %v1147_v32 = vand.u32 2, %v1123_v23  ;;  %4444 = vst [vmem:[#allocation15_spill] sm:$0xff] %v2938_v61 }
 0x13b   :  { %v1003_v33 = vadd.f32 %v979_v4, %v4443_v11  ;;  %v712_v31 = vadd.f32 0.041666646, %v688_v48  ;;  %v784_v55 = vmul.f32 0.5, %v2752_v15  ;;  %v2933_v12 = vmul.f32 %v2883_v59, %v2883_v59 }
 0x13c   :  { %vm1051_vm13 = vcmp.eq.s32.totalorder %v1027_v10, 1  ;;  %v736_v19 = vmul.f32 %v2752_v15, %v2752_v15  ;;  %v880_v35 = vadd.f32 0.008332161, %v856_v27  ;;  %vm1267_vm14 = vcmp.ne.s32.totalorder %v1243_v57, 0  ;;  %v2945_v57 = vpop.permute.xlu0 %185 }
 0x13d   :  { %v1075_v47 = vsel %vm1051_vm13, %v1003_v33, %v835_v38  ;;  %v1099_v24 = vsel %vm1051_vm13, %v835_v38, %v1003_v33  ;;  %v1024_v45 = vand.u32 1, %v592_v25  ;;  %vm1171_vm15 = vcmp.ne.s32.totalorder %v1147_v32, 0  ;;  %4446 = vst [vmem:[#allocation8_spill] sm:$0xff] %v2945_v57 }
 0x13e   :  { %v1195_v40 = vsub.f32 0.0, %v1075_v47  ;;  %v1291_v56 = vsub.f32 0.0, %v1099_v24  ;;  %v760_v53 = vmul.f32 %v736_v19, %v712_v31  ;;  %v904_v50 = vmul.f32 %v880_v35, %v2752_v15 }
 0x13f   :  { %v808_v1 = vsub.f32 1.0, %v784_v55  ;;  %v1120_v30 = vadd.s32 1, %v592_v25  ;;  %v649_v23 = vmul.f32 2.4433157e-05, %v625_v8  ;;  %v1240_v0 = vand.u32 2, %v592_v25 }
 0x140   :  { %v2940_v34 = vsel %vm1171_vm15, %v1195_v40, %v1075_v47  ;;  %v2942_v28 = vsel %vm1267_vm14, %v1291_v56, %v1099_v24  ;;  %v928_v10 = vadd.f32 -0.16666655, %v904_v50  ;;  %v961_v4 = vmul.f32 %v625_v8, %v2865_v42 }
 0x141   :  { %4445 = vst [vmem:[#allocation17_spill] sm:$0xff] %v2942_v28  ;;  %1373 = vrot.lane.b32.xlu1 %v2940_v34, %s1775_s22  ;;  %v673_v15 = vadd.f32 -0.0013887316, %v649_v23  ;;  %v793_v48 = vmul.f32 0.5, %v625_v8  ;;  %v865_v38 = vmul.f32 -0.00019515296, %v625_v8  ;;  %v832_v11 = vadd.f32 %v808_v1, %v760_v53 }
 0x142   :  { %v2949_v27 = vand.u32 3, %v1680_v58  ;;  %v976_v33 = vmul.f32 %v2860_v16, %v928_v10  ;;  %vm1048_vm0 = vcmp.eq.s32.totalorder %v1024_v45, 1  ;;  %v1144_v32 = vand.u32 2, %v1120_v30  ;;  %v2959_v58 = vpop.permute.xlu1 %195 }
 0x143   :  { %v697_v31 = vmul.f32 %v673_v15, %v625_v8  ;;  %v889_v55 = vadd.f32 0.008332161, %v865_v38  ;;  %v646_v25 = vmul.f32 2.4433157e-05, %v2933_v12  ;;  %vm2954_vm1 = vcmp.ne.s32.totalorder %v1240_v0, 0  ;;  %4449 = vst [vmem:[#allocation19_spill] sm:$0xff] %v2959_v58 }
 0x144   :  { %v1000_v19 = vadd.f32 %v976_v33, %v2645_v41  ;;  %v745_v47 = vmul.f32 %v625_v8, %v625_v8  ;;  %v1033_v24 = vand.u32 1, %v2869_v22  ;;  %v817_v56 = vsub.f32 1.0, %v793_v48  ;;  %v2963_v41 = vpop.permute.xlu0 %189 }
 0x145   :  { %v721_v40 = vadd.f32 0.041666646, %v697_v31  ;;  %v913_v16 = vmul.f32 %v889_v55, %v625_v8  ;;  %v670_v45 = vadd.f32 -0.0013887316, %v646_v25  ;;  %v1129_v1 = vadd.s32 1, %v2869_v22  ;;  %4450 = vst [vmem:[#allocation22_spill] sm:$0xff] %v2963_v41 }
 0x146   :  { %v1072_v53 = vsel %vm1048_vm0, %v1000_v19, %v832_v11  ;;  %v1096_v50 = vsel %vm1048_vm0, %v832_v11, %v1000_v19  ;;  %v862_v30 = vmul.f32 -0.00019515296, %v2933_v12  ;;  %vm1168_vm2 = vcmp.ne.s32.totalorder %v1144_v32, 0 }
 0x147   :  { %v1192_v23 = vsub.f32 0.0, %v1072_v53  ;;  %v1288_v10 = vsub.f32 0.0, %v1096_v50  ;;  %v769_v0 = vmul.f32 %v745_v47, %v721_v40  ;;  %v937_v15 = vadd.f32 -0.16666655, %v913_v16  ;;  %v2980_v40 = vpop.permute.xlu1 %199 }
 0x148   :  { %v694_v38 = vmul.f32 %v670_v45, %v2933_v12  ;;  %v790_v33 = vmul.f32 0.5, %v2933_v12  ;;  %v886_v48 = vadd.f32 0.008332161, %v862_v30  ;;  %v958_v25 = vmul.f32 %v2933_v12, %v2883_v59  ;;  %v2985_v30 = vpop.permute.xlu0 %193 }
 0x149   :  { %v2967_v8 = vsel %vm1168_vm2, %v1192_v23, %v1072_v53  ;;  %v2971_v11 = vsel %vm2954_vm1, %v1288_v10, %v1096_v50  ;;  %v841_v31 = vadd.f32 %v817_v56, %v769_v0  ;;  %v985_v55 = vmul.f32 %v961_v4, %v937_v15  ;;  %4452 = vst [vmem:[#allocation27_spill] sm:$0xff] %v2985_v30 }
 0x14a   :  { %4451 = vst [vmem:[#allocation23_spill] sm:$0xff] %v2971_v11  ;;  %1371 = vrot.lane.b32.xlu0 %v2967_v8, %s1775_s22  ;;  %v718_v32 = vadd.f32 0.041666646, %v694_v38  ;;  %v742_v19 = vmul.f32 %v2933_v12, %v2933_v12  ;;  %v910_v47 = vmul.f32 %v886_v48, %v2933_v12  ;;  %vm1057_vm5 = vcmp.eq.s32.totalorder %v1033_v24, 1 }
 0x14b   :  { %v1009_v35 = vadd.f32 %v985_v55, %v2865_v42  ;;  %v1153_v16 = vand.u32 2, %v1129_v1  ;;  %v1249_v4 = vand.u32 2, %v2869_v22  ;;  %v814_v45 = vsub.f32 1.0, %v790_v33  ;;  %v4453_v22 = vld [vmem:[#allocation29_spill] sm:$0xff]  ;;  %v4454_v33 = vld [vmem:[#allocation30_spill] sm:$0xff]  ;;  %v2998_v30 = vpop.permute.xlu1 %203 }
 0x14c   :  { %v766_v56 = vmul.f32 %v742_v19, %v718_v32  ;;  %v934_v53 = vadd.f32 -0.16666655, %v910_v47  ;;  %v1126_v50 = vadd.s32 1, %v2949_v27  ;;  %v1030_v0 = vand.u32 1, %v2949_v27  ;;  %v4456_v47 = vld [vmem:[#allocation52_spill] sm:$0xff]  ;;  %4457 = vst [vmem:[#allocation24_spill] sm:$0xff] %v2998_v30 }
 0x14d   :  { %v1081_v23 = vsel %vm1057_vm5, %v1009_v35, %v841_v31  ;;  %v1105_v10 = vsel %vm1057_vm5, %v841_v31, %v1009_v35  ;;  %v1246_v12 = vand.u32 2, %v2949_v27  ;;  %vm1177_vm6 = vcmp.ne.s32.totalorder %v1153_v16, 0 }
 0x14e   :  { %v1201_v15 = vsub.f32 0.0, %v1081_v23  ;;  %v1297_v38 = vsub.f32 0.0, %v1105_v10  ;;  %v838_v42 = vadd.f32 %v814_v45, %v766_v56  ;;  %v982_v24 = vmul.f32 %v958_v25, %v934_v53  ;;  %v3003_v45 = vpop.permute.xlu0 %197 }
 0x14f   :  { %vm1273_vm7 = vcmp.ne.s32.totalorder %v1249_v4, 0  ;;  %v1652_v1 = vcvt.f32.s32 %v4453_v22  ;;  %v632_v48 = vmul.f32 2.4433157e-05, %v4454_v33  ;;  %v1150_v19 = vand.u32 2, %v1126_v50 }
 0x150   :  { %v2991_v55 = vsel %vm1177_vm6, %v1201_v15, %v1081_v23  ;;  %v2993_v32 = vsel %vm1273_vm7, %v1297_v38, %v1105_v10  ;;  %v1006_v31 = vadd.f32 %v982_v24, %v2883_v59  ;;  %v482_v35 = vfloor.f32 %v4456_v47  ;;  %v4460_v24 = vld [vmem:[#allocation35_spill] sm:$0xff] }
 0x151   :  { %4455 = vst [vmem:[#allocation31_spill] sm:$0xff] %v2993_v32  ;;  %v431_v27 = vmul.f32 0.011111111, %v2678_v37  ;;  %1377 = vrot.lane.b32.xlu1 %v2991_v55, %s1775_s22  ;;  %vm1054_vm8 = vcmp.eq.s32.totalorder %v1030_v0, 1  ;;  %v656_v25 = vadd.f32 -0.0013887316, %v632_v48  ;;  %v728_v10 = vmul.f32 %v4454_v33, %v4454_v33 }
 0x152   :  { %v1078_v16 = vsel %vm1054_vm8, %v1006_v31, %v838_v42  ;;  %v1102_v4 = vsel %vm1054_vm8, %v838_v42, %v1006_v31  ;;  %vm1270_vm9 = vcmp.ne.s32.totalorder %v1246_v12, 0  ;;  %v848_v56 = vmul.f32 -0.00019515296, %v4454_v33  ;;  %v4461_v48 = vld [vmem:[#allocation46_spill] sm:$0xff]  ;;  %v3035_v11 = vpop.permute.xlu0 %201 }
 0x153   :  { %v1198_v59 = vsub.f32 0.0, %v1078_v16  ;;  %v1294_v53 = vsub.f32 0.0, %v1102_v4  ;;  %v584_v50 = vand.u32 3, %v1652_v1  ;;  %v680_v23 = vmul.f32 %v656_v25, %v4454_v33  ;;  %v4462_v31 = vld [vmem:[#allocation50_spill] sm:$0xff]  ;;  %4465 = vst [vmem:[#allocation41_spill] sm:$0xff] %v3035_v11  ;;  %v4472_v11 = vld [vmem:[#allocation40_spill] sm:$0xff] }
 0x154   :  { %vm1174_vm10 = vcmp.ne.s32.totalorder %v1150_v19, 0  ;;  %v776_v15 = vmul.f32 0.5, %v4454_v33  ;;  %v872_v0 = vadd.f32 0.008332161, %v848_v56  ;;  %v1646_v22 = vcvt.f32.s32 %v4460_v24 }
 0x155   :  { %v3009_v38 = vsel %vm1174_vm10, %v1198_v59, %v1078_v16  ;;  %v3011_v42 = vsel %vm1270_vm9, %v1294_v53, %v1102_v4  ;;  %v704_v12 = vadd.f32 0.041666646, %v680_v23  ;;  %v3016_v47 = vmul.f32 %v4462_v31, %v4461_v48  ;;  %v3027_v4 = vpop.permute.xlu1 %207  ;;  %v4464_v53 = vld [vmem:[#allocation33_spill] sm:$0xff] }
 0x156   :  { %4458 = vst [vmem:[#allocation32_spill] sm:$0xff] %v3009_v38  ;;  %4459 = vst [vmem:[#allocation25_spill] sm:$0xff] %v3011_v42  ;;  %v3018_v1 = vmul.f32 90.0, %v482_v35  ;;  %v3020_v19 = vtrunc.f32 %v482_v35  ;;  %1375 = vrot.lane.b32.xlu0 %v3009_v38, %s1775_s22  ;;  %v896_v25 = vmul.f32 %v872_v0, %v4454_v33  ;;  %v3025_v16 = vadd.f32 0.5, %v431_v27 }
 0x157   :  { %4463 = vst [vmem:[#allocation51_spill] sm:$0xff] %v3027_v4  ;;  %v752_v56 = vmul.f32 %v728_v10, %v704_v12  ;;  %v1016_v59 = vand.u32 1, %v584_v50  ;;  %v629_v23 = vmul.f32 2.4433157e-05, %v4464_v53  ;;  %v800_v24 = vsub.f32 1.0, %v776_v15  ;;  %v4466_v10 = vld [vmem:[#allocation45_spill] sm:$0xff] }
 0x158   :  { %v920_v42 = vadd.f32 -0.16666655, %v896_v25  ;;  %v1112_v32 = vadd.s32 1, %v584_v50  ;;  %v845_v58 = vmul.f32 -0.00019515296, %v4464_v53  ;;  %v3033_v35 = vmul.f32 %v2672_v5, %v2672_v5  ;;  %v4468_v4 = vld [vmem:[#allocation26_spill] sm:$0xff] }
 0x159   :  { %v581_v33 = vand.u32 3, %v1646_v22  ;;  %v653_v27 = vadd.f32 -0.0013887316, %v629_v23  ;;  %v773_v0 = vmul.f32 0.5, %v4464_v53  ;;  %v824_v28 = vadd.f32 %v800_v24, %v752_v56  ;;  %v3047_v57 = vpop.permute.xlu1 %211 }
 0x15a   :  { %v968_v15 = vmul.f32 %v4467_v21, %v920_v42  ;;  %v869_v25 = vadd.f32 0.008332161, %v845_v58  ;;  %vm1040_vm13 = vcmp.eq.s32.totalorder %v1016_v59, 1  ;;  %v1232_v41 = vand.u32 2, %v584_v50  ;;  %4469 = vst [vmem:[#allocation29_spill] sm:$0xff] %v3047_v57  ;;  %v4470_v50 = vld [vmem:[#allocation39_spill] sm:$0xff] }
 0x15b   :  { %v677_v61 = vmul.f32 %v653_v27, %v4464_v53  ;;  %v1136_v2 = vand.u32 2, %v1112_v32  ;;  %v725_v22 = vmul.f32 %v4464_v53, %v4464_v53  ;;  %v797_v24 = vsub.f32 1.0, %v773_v0  ;;  %v3050_v27 = vpop.permute.xlu0 %205 }
 0x15c   :  { %v992_v7 = vadd.f32 %v968_v15, %v4468_v4  ;;  %v893_v23 = vmul.f32 %v869_v25, %v4464_v53  ;;  %v1013_v21 = vand.u32 1, %v581_v33  ;;  %v1109_v58 = vadd.s32 1, %v581_v33  ;;  %4471 = vst [vmem:[#allocation30_spill] sm:$0xff] %v3050_v27 }
 0x15d   :  { %v701_v56 = vadd.f32 0.041666646, %v677_v61  ;;  %v1664_v54 = vcvt.f32.s32 %v4470_v50  ;;  %v638_v46 = vmul.f32 2.4433157e-05, %v4472_v11  ;;  %vm1160_vm14 = vcmp.ne.s32.totalorder %v1136_v2, 0  ;;  %v4473_v61 = vld [vmem:[#allocation38_spill] sm:$0xff] }
 0x15e   :  { %v1064_v42 = vsel %vm1040_vm13, %v992_v7, %v824_v28  ;;  %v1088_v12 = vsel %vm1040_vm13, %v824_v28, %v992_v7  ;;  %v917_v59 = vadd.f32 -0.16666655, %v893_v23  ;;  %vm1256_vm15 = vcmp.ne.s32.totalorder %v1232_v41, 0  ;;  %v4475_v23 = vld [vmem:[#allocation28_spill] sm:$0xff] }
 0x15f   :  { %v1184_v4 = vsub.f32 0.0, %v1064_v42  ;;  %v1280_v32 = vsub.f32 0.0, %v1088_v12  ;;  %v749_v15 = vmul.f32 %v725_v22, %v701_v56  ;;  %v662_v28 = vadd.f32 -0.0013887316, %v638_v46 }
 0x160   :  { %v965_v0 = vmul.f32 %v4473_v61, %v917_v59  ;;  %v1133_v22 = vand.u32 2, %v1109_v58  ;;  %v1229_v56 = vand.u32 2, %v581_v33  ;;  %v854_v27 = vmul.f32 -0.00019515296, %v4472_v11  ;;  %v3067_v59 = vpop.permute.xlu1 %215 }
 0x161   :  { %v3055_v25 = vsel %vm1160_vm14, %v1184_v4, %v1064_v42  ;;  %v3057_v57 = vsel %vm1256_vm15, %v1280_v32, %v1088_v12  ;;  %v821_v7 = vadd.f32 %v797_v24, %v749_v15  ;;  %v4476_v2 = vfloor.f32 %v3025_v16  ;;  %4477 = vst [vmem:[#allocation35_spill] sm:$0xff] %v3067_v59  ;;  %v3071_v15 = vpop.permute.xlu0 %209 }
 0x162   :  { %4474 = vst [vmem:[#allocation52_spill] sm:$0xff] %v3057_v57  ;;  %1381 = vrot.lane.b32.xlu1 %v3055_v25, %s1775_s22  ;;  %v989_v50 = vadd.f32 %v965_v0, %v4475_v23  ;;  %vm1037_vm0 = vcmp.eq.s32.totalorder %v1013_v21, 1  ;;  %v590_v12 = vand.u32 3, %v1664_v54  ;;  %v686_v24 = vmul.f32 %v662_v28, %v4472_v11  ;;  %4478 = vst [vmem:[#allocation46_spill] sm:$0xff] %v3071_v15  ;;  %v4479_v54 = vld [vmem:[#allocation43_spill] sm:$0xff] }
 0x163   :  { %v3065_v41 = vmul.f32 90.0, %v4476_v2  ;;  %v782_v4 = vmul.f32 0.5, %v4472_v11  ;;  %v878_v32 = vadd.f32 0.008332161, %v854_v27  ;;  %v734_v0 = vmul.f32 %v4472_v11, %v4472_v11  ;;  %v4481_v27 = vld [vmem:[#allocation42_spill] sm:$0xff] }
 0x164   :  { %v1061_v46 = vsel %vm1037_vm0, %v989_v50, %v821_v7  ;;  %v1085_v42 = vsel %vm1037_vm0, %v821_v7, %v989_v50  ;;  %v710_v61 = vadd.f32 0.041666646, %v686_v24  ;;  %vm1157_vm1 = vcmp.ne.s32.totalorder %v1133_v22, 0 }
 0x165   :  { %v1181_v33 = vsub.f32 0.0, %v1061_v46  ;;  %v1277_v58 = vsub.f32 0.0, %v1085_v42  ;;  %vm1253_vm2 = vcmp.ne.s32.totalorder %v1229_v56, 0  ;;  %v902_v21 = vmul.f32 %v878_v32, %v4472_v11  ;;  %v3088_v11 = vpop.permute.xlu1 %219 }
 0x166   :  { %v1658_v23 = vcvt.f32.s32 %v4479_v54  ;;  %v758_v50 = vmul.f32 %v734_v0, %v710_v61  ;;  %v635_v2 = vmul.f32 2.4433157e-05, %v4481_v27  ;;  %v806_v24 = vsub.f32 1.0, %v782_v4  ;;  %4482 = vst [vmem:[#allocation33_spill] sm:$0xff] %v3088_v11  ;;  %v3102_v11 = vpop.permute.xlu0 %213 }
 0x167   :  { %v3077_v28 = vsel %vm1157_vm1, %v1181_v33, %v1061_v46  ;;  %v3079_v7 = vsel %vm1253_vm2, %v1277_v58, %v1085_v42  ;;  %v926_v53 = vadd.f32 -0.16666655, %v902_v21  ;;  %v1022_v57 = vand.u32 1, %v590_v12  ;;  %v4483_v33 = vld [vmem:[#allocation44_spill] sm:$0xff]  ;;  %4486 = vst [vmem:[#allocation45_spill] sm:$0xff] %v3102_v11 }
 0x168   :  { %4480 = vst [vmem:[#allocation50_spill] sm:$0xff] %v3079_v7  ;;  %1379 = vrot.lane.b32.xlu0 %v3077_v28, %s1775_s22  ;;  %v1118_v59 = vadd.s32 1, %v590_v12  ;;  %v3086_v22 = vmul.f32 %v3033_v35, %v2672_v5  ;;  %v1238_v56 = vand.u32 2, %v590_v12  ;;  %v659_v46 = vadd.f32 -0.0013887316, %v635_v2 }
 0x169   :  { %v851_v42 = vmul.f32 -0.00019515296, %v4481_v27  ;;  %v830_v32 = vadd.f32 %v806_v24, %v758_v50  ;;  %v974_v58 = vmul.f32 %v4483_v33, %v926_v53  ;;  %v587_v61 = vand.u32 3, %v1658_v23  ;;  %v4487_v23 = vld [vmem:[#allocation34_spill] sm:$0xff] }
 0x16a   :  { %v779_v0 = vmul.f32 0.5, %v4481_v27  ;;  %v4484_v4 = vsub.f32 %v4466_v10, %v3018_v1  ;;  %v4485_v54 = vfloor.f32 %v3025_v16  ;;  %v683_v12 = vmul.f32 %v659_v46, %v4481_v27  ;;  %v3119_v15 = vpop.permute.xlu0 %217 }
 0x16b   :  { %v875_v2 = vadd.f32 0.008332161, %v851_v42  ;;  %v527_v53 = vsub.f32 %v2678_v37, %v3065_v41  ;;  %v998_v50 = vadd.f32 %v974_v58, %v4487_v23  ;;  %vm1046_vm5 = vcmp.eq.s32.totalorder %v1022_v57, 1  ;;  %v3115_v57 = vpop.permute.xlu1 %223  ;;  %4492 = vst [vmem:[#allocation26_spill] sm:$0xff] %v3119_v15 }
 0x16c   :  { %v3096_v21 = vmul.f32 0.017453292, %v4484_v4  ;;  %v3100_v7 = vtrunc.f32 %v4485_v54  ;;  %v1142_v24 = vand.u32 2, %v1118_v59  ;;  %vm3108_vm6 = vcmp.ne.s32.totalorder %v1238_v56, 0  ;;  %4490 = vst [vmem:[#allocation36_spill] sm:$0xff] %v3115_v57  ;;  %v4491_v56 = vld [vmem:[#allocation48_spill] sm:$0xff] }
 0x16d   :  { %v707_v10 = vadd.f32 0.041666646, %v683_v12  ;;  %v731_v16 = vmul.f32 %v4481_v27, %v4481_v27  ;;  %v899_v33 = vmul.f32 %v875_v2, %v4481_v27  ;;  %v1070_v4 = vsel %vm1046_vm5, %v998_v50, %v830_v32 }
 0x16e   :  { %v1094_v46 = vsel %vm1046_vm5, %v830_v32, %v998_v50  ;;  %v803_v42 = vsub.f32 1.0, %v779_v0  ;;  %v1115_v54 = vadd.s32 1, %v587_v61  ;;  %v1190_v11 = vsub.f32 0.0, %v1070_v4  ;;  %v4494_v0 = vld [vmem:[#allocation47_spill] sm:$0xff] }
 0x16f   :  { %v1286_v37 = vsub.f32 0.0, %v1094_v46  ;;  %v755_v41 = vmul.f32 %v731_v16, %v707_v10  ;;  %v923_v58 = vadd.f32 -0.16666655, %v899_v33  ;;  %vm1166_vm7 = vcmp.ne.s32.totalorder %v1142_v24, 0  ;;  %v4495_v33 = vld [vmem:[#allocation37_spill] sm:$0xff] }
 0x170   :  { %v1019_v59 = vand.u32 1, %v587_v61  ;;  %v1676_v23 = vcvt.f32.s32 %v4491_v56  ;;  %v644_v12 = vmul.f32 2.4433157e-05, %v4462_v31  ;;  %v3121_v30 = vsel %vm1166_vm7, %v1190_v11, %v1070_v4 }
 0x171   :  { %v3125_v27 = vsel %vm3108_vm6, %v1286_v37, %v1094_v46  ;;  %v827_v32 = vadd.f32 %v803_v42, %v755_v41  ;;  %v971_v2 = vmul.f32 %v4494_v0, %v923_v58  ;;  %v3128_v50 = vmul.f32 0.017453292, %v527_v53  ;;  %1385 = vrot.lane.b32.xlu1 %v3121_v30, %s1775_s22  ;;  %v4496_v41 = vld [vmem:[#allocation49_spill] sm:$0xff] }
 0x172   :  { %4493 = vst [vmem:[#allocation39_spill] sm:$0xff] %v3125_v27  ;;  %v1235_v24 = vand.u32 2, %v587_v61  ;;  %v596_v10 = vand.u32 3, %v1676_v23  ;;  %v668_v16 = vadd.f32 -0.0013887316, %v644_v12  ;;  %v1139_v57 = vand.u32 2, %v1115_v54  ;;  %v3140_v23 = vpop.permute.xlu1 %227 }
 0x173   :  { %v995_v56 = vadd.f32 %v971_v2, %v4495_v33  ;;  %v860_v11 = vmul.f32 -0.00019515296, %v4462_v31  ;;  %v641_v1 = vmul.f32 2.4433157e-05, %v3033_v35  ;;  %vm1043_vm8 = vcmp.eq.s32.totalorder %v1019_v59, 1  ;;  %4497 = vst [vmem:[#allocation40_spill] sm:$0xff] %v3140_v23  ;;  %v3142_v59 = vpop.permute.xlu0 %221 }
 0x174   :  { %v692_v4 = vmul.f32 %v668_v16, %v4462_v31  ;;  %v740_v53 = vmul.f32 %v4462_v31, %v4462_v31  ;;  %v788_v46 = vmul.f32 0.5, %v4462_v31  ;;  %v1670_v58 = vcvt.f32.s32 %v4496_v41  ;;  %4498 = vst [vmem:[#allocation38_spill] sm:$0xff] %v3142_v59 }
 0x175   :  { %v1067_v42 = vsel %vm1043_vm8, %v995_v56, %v827_v32  ;;  %v1091_v37 = vsel %vm1043_vm8, %v827_v32, %v995_v56  ;;  %v884_v61 = vadd.f32 0.008332161, %v860_v11  ;;  %v1124_v2 = vadd.s32 1, %v596_v10 }
 0x176   :  { %v1187_v54 = vsub.f32 0.0, %v1067_v42  ;;  %v1283_v12 = vsub.f32 0.0, %v1091_v37  ;;  %v716_v0 = vadd.f32 0.041666646, %v692_v4  ;;  %vm1163_vm9 = vcmp.ne.s32.totalorder %v1139_v57, 0 }
 0x177   :  { %vm1259_vm10 = vcmp.ne.s32.totalorder %v1235_v24, 0  ;;  %v908_v16 = vmul.f32 %v884_v61, %v4462_v31  ;;  %v665_v33 = vadd.f32 -0.0013887316, %v641_v1  ;;  %v812_v56 = vsub.f32 1.0, %v788_v46  ;;  %v3157_v61 = vpop.permute.xlu1 %256 }
 0x178   :  { %v3145_v27 = vsel %vm1163_vm9, %v1187_v54, %v1067_v42  ;;  %v3147_v15 = vsel %vm1259_vm10, %v1283_v12, %v1091_v37  ;;  %v764_v32 = vmul.f32 %v740_v53, %v716_v0  ;;  %v1028_v41 = vand.u32 1, %v596_v10 }
 0x179   :  { %4499 = vst [vmem:[#allocation28_spill] sm:$0xff] %v3147_v15  ;;  %1383 = vrot.lane.b32.xlu0 %v3145_v27, %s1775_s22  ;;  %v932_v11 = vadd.f32 -0.16666655, %v908_v16  ;;  %v593_v4 = vand.u32 3, %v1670_v58  ;;  %v689_v57 = vmul.f32 %v665_v33, %v3033_v35  ;;  %v1148_v24 = vand.u32 2, %v1124_v2 }
 0x17a   :  { %v1244_v23 = vand.u32 2, %v596_v10  ;;  %v737_v31 = vmul.f32 %v3033_v35, %v3033_v35  ;;  %v857_v1 = vmul.f32 -0.00019515296, %v3033_v35  ;;  %v836_v42 = vadd.f32 %v812_v56, %v764_v32  ;;  %v3171_v32 = vpop.permute.xlu0 %225 }
 0x17b   :  { %v980_v37 = vmul.f32 %v3016_v47, %v932_v11  ;;  %v713_v53 = vadd.f32 0.041666646, %v689_v57  ;;  %v785_v46 = vmul.f32 0.5, %v3033_v35  ;;  %v4500_v54 = vcvt.f32.s32 %v3020_v19  ;;  %4501 = vst [vmem:[#allocation43_spill] sm:$0xff] %v3171_v32  ;;  %v3182_v59 = vpop.permute.xlu1 %260 }
 0x17c   :  { %v626_v10 = vmul.f32 %v3096_v21, %v3096_v21  ;;  %v1682_v12 = vcvt.f32.s32 %v3100_v7  ;;  %v881_v0 = vadd.f32 0.008332161, %v857_v1  ;;  %v3168_v2 = vmul.f32 %v3128_v50, %v3128_v50 }
 0x17d   :  { %v3161_v58 = vand.u32 3, %v4500_v54  ;;  %v1004_v47 = vadd.f32 %v980_v37, %v4461_v48  ;;  %v761_v16 = vmul.f32 %v737_v31, %v713_v53  ;;  %v1121_v33 = vadd.s32 1, %v593_v4 }
 0x17e   :  { %vm1052_vm13 = vcmp.eq.s32.totalorder %v1028_v41, 1  ;;  %vm3173_vm14 = vcmp.ne.s32.totalorder %v1148_v24, 0  ;;  %vm3177_vm15 = vcmp.ne.s32.totalorder %v1244_v23, 0  ;;  %v905_v7 = vmul.f32 %v881_v0, %v3033_v35 }
 0x17f   :  { %v1076_v11 = vsel %vm1052_vm13, %v1004_v47, %v836_v42  ;;  %v1100_v57 = vsel %vm1052_vm13, %v836_v42, %v1004_v47  ;;  %v809_v1 = vsub.f32 1.0, %v785_v46  ;;  %v1025_v54 = vand.u32 1, %v593_v4 }
 0x180   :  { %v1196_v48 = vsub.f32 0.0, %v1076_v11  ;;  %v1292_v31 = vsub.f32 0.0, %v1100_v57  ;;  %v929_v37 = vadd.f32 -0.16666655, %v905_v7  ;;  %v650_v53 = vmul.f32 2.4433157e-05, %v626_v10 }
 0x181   :  { %v833_v32 = vadd.f32 %v809_v1, %v761_v16  ;;  %v1145_v41 = vand.u32 2, %v1121_v33  ;;  %v1241_v24 = vand.u32 2, %v593_v4  ;;  %v866_v15 = vmul.f32 -0.00019515296, %v626_v10  ;;  %v3201_v33 = vpop.permute.xlu0 %254 }
 0x182   :  { %v3186_v23 = vsel %vm3173_vm14, %v1196_v48, %v1076_v11  ;;  %v1316_v35 = vsel %vm3177_vm15, %v1292_v31, %v1100_v57  ;;  %v977_v42 = vmul.f32 %v3086_v22, %v929_v37  ;;  %v674_v46 = vadd.f32 -0.0013887316, %v650_v53 }
 0x183   :  { %v962_v0 = vmul.f32 %v626_v10, %v3096_v21  ;;  %v3192_v47 = vand.u32 3, %v1682_v12  ;;  %v3197_v4 = vsel %vm101_vm12, %v3186_v23, %v1316_v35  ;;  %1389 = vrot.lane.b32.xlu1 %v3186_v23, %s1775_s22  ;;  %v890_v16 = vadd.f32 0.008332161, %v866_v15 }
 0x184   :  { %4506 = vst [vmem:[#allocation42_spill] sm:$0xff] %v3197_v4  ;;  %v1001_v19 = vadd.f32 %v977_v42, %v2672_v5  ;;  %vm1049_vm0 = vcmp.eq.s32.totalorder %v1025_v54, 1  ;;  %v698_v22 = vmul.f32 %v674_v46, %v626_v10  ;;  %v794_v56 = vmul.f32 0.5, %v626_v10 }
 0x185   :  { %vm3204_vm1 = vcmp.ne.s32.totalorder %v1145_v41, 0  ;;  %vm3208_vm2 = vcmp.ne.s32.totalorder %v1241_v24, 0  ;;  %v914_v11 = vmul.f32 %v890_v16, %v626_v10  ;;  %v647_v57 = vmul.f32 2.4433157e-05, %v3168_v2  ;;  %v3214_v41 = vpop.permute.xlu1 %264 }
 0x186   :  { %v1073_v1 = vsel %vm1049_vm0, %v1001_v19, %v833_v32  ;;  %v1097_v15 = vsel %vm1049_vm0, %v833_v32, %v1001_v19  ;;  %v722_v48 = vadd.f32 0.041666646, %v698_v22  ;;  %v746_v31 = vmul.f32 %v626_v10, %v626_v10  ;;  %v3224_v22 = vpop.permute.xlu0 %258 }
 0x187   :  { %v1193_v37 = vsub.f32 0.0, %v1073_v1  ;;  %v1289_v5 = vsub.f32 0.0, %v1097_v15  ;;  %v938_v54 = vadd.f32 -0.16666655, %v914_v11  ;;  %v1130_v53 = vadd.s32 1, %v3161_v58 }
 0x188   :  { %v770_v35 = vmul.f32 %v746_v31, %v722_v48  ;;  %v818_v42 = vsub.f32 1.0, %v794_v56  ;;  %v1034_v24 = vand.u32 1, %v3161_v58  ;;  %v671_v46 = vadd.f32 -0.0013887316, %v647_v57 }
 0x189   :  { %v3219_v16 = vsel %vm3204_vm1, %v1193_v37, %v1073_v1  ;;  %v1313_v32 = vsel %vm3208_vm2, %v1289_v5, %v1097_v15  ;;  %v986_v10 = vmul.f32 %v962_v0, %v938_v54  ;;  %v863_v19 = vmul.f32 -0.00019515296, %v3168_v2 }
 0x18a   :  { %v3229_v11 = vsel %vm101_vm12, %v3219_v16, %v1313_v32  ;;  %1387 = vrot.lane.b32.xlu0 %v3219_v16, %s1775_s22  ;;  %v842_v56 = vadd.f32 %v818_v42, %v770_v35  ;;  %v1250_v7 = vand.u32 2, %v3161_v58  ;;  %v695_v57 = vmul.f32 %v671_v46, %v3168_v2  ;;  %v3242_v35 = vpop.permute.xlu1 %268 }
 0x18b   :  { %4511 = vst [vmem:[#allocation44_spill] sm:$0xff] %v3229_v11  ;;  %v1010_v12 = vadd.f32 %v986_v10, %v3096_v21  ;;  %v1154_v0 = vand.u32 2, %v1130_v53  ;;  %v791_v1 = vmul.f32 0.5, %v3168_v2  ;;  %v887_v15 = vadd.f32 0.008332161, %v863_v19  ;;  %v3245_v10 = vpop.permute.xlu0 %262 }
 0x18c   :  { %vm1058_vm5 = vcmp.eq.s32.totalorder %v1034_v24, 1  ;;  %v719_v48 = vadd.f32 0.041666646, %v695_v57  ;;  %v743_v31 = vmul.f32 %v3168_v2, %v3168_v2  ;;  %v959_v37 = vmul.f32 %v3168_v2, %v3128_v50 }
 0x18d   :  { %v1082_v5 = vsel %vm1058_vm5, %v1010_v12, %v842_v56  ;;  %v1106_v54 = vsel %vm1058_vm5, %v842_v56, %v1010_v12  ;;  %v911_v58 = vmul.f32 %v887_v15, %v3168_v2  ;;  %vm1274_vm6 = vcmp.ne.s32.totalorder %v1250_v7, 0 }
 0x18e   :  { %v1202_v42 = vsub.f32 0.0, %v1082_v5  ;;  %v1298_v21 = vsub.f32 0.0, %v1106_v54  ;;  %v767_v53 = vmul.f32 %v743_v31, %v719_v48  ;;  %vm1178_vm7 = vcmp.ne.s32.totalorder %v1154_v0, 0  ;;  %v3255_v15 = vpop.permute.xlu1 %272 }
 0x18f   :  { %v815_v46 = vsub.f32 1.0, %v791_v1  ;;  %v935_v24 = vadd.f32 -0.16666655, %v911_v58  ;;  %v1127_v32 = vadd.s32 1, %v3192_v47  ;;  %v1031_v11 = vand.u32 1, %v3192_v47 }
 0x190   :  { %v1226_v19 = vsel %vm1178_vm7, %v1202_v42, %v1082_v5  ;;  %v1322_v57 = vsel %vm1274_vm6, %v1298_v21, %v1106_v54  ;;  %v1247_v1 = vand.u32 2, %v3192_v47  ;;  %v3259_v5 = vpop.permute.xlu0 %266  ;;  %v4514_v21 = vld [vmem:[#allocation12_spill] sm:$0xff]  ;;  %vm104_vm0 = vcmp.eq.s32.totalorder %v2084_v43, 1 }
 0x191   :  { %v3250_v2 = vsel %vm101_vm12, %v1226_v19, %v1322_v57  ;;  %1393 = vrot.lane.b32.xlu1 %v1226_v19, %s1775_s22  ;;  %v839_v56 = vadd.f32 %v815_v46, %v767_v53  ;;  %v983_v7 = vmul.f32 %v959_v37, %v935_v24  ;;  %v1151_v0 = vand.u32 2, %v1127_v32 }
 0x192   :  { %4512 = vst [vmem:[#allocation34_spill] sm:$0xff] %v3250_v2  ;;  %vm1055_vm8 = vcmp.eq.s32.totalorder %v1031_v11, 1  ;;  %vm1271_vm10 = vcmp.ne.s32.totalorder %v1247_v1, 0  ;;  %v3268_v47 = vpop.permute.xlu1 %276  ;;  %vm107_vm7 = vcmp.eq.s32.totalorder %v2084_v43, 2 }
 0x193   :  { %v1007_v12 = vadd.f32 %v983_v7, %v3128_v50  ;;  %vm1175_vm9 = vcmp.ne.s32.totalorder %v1151_v0, 0 }
 0x194   :  { %v3270_v11 = vpop.permute.xlu0 %270 }
 0x195   :  { %v1079_v48 = vsel %vm1055_vm8, %v1007_v12, %v839_v56  ;;  %v1103_v31 = vsel %vm1055_vm8, %v839_v56, %v1007_v12  ;;  %1422 = vrot.lane.b32.xlu1 %v2583_v26, %s1772_s20 }
 0x196   :  { %v1199_v54 = vsub.f32 0.0, %v1079_v48  ;;  %v1295_v58 = vsub.f32 0.0, %v1103_v31  ;;  %v3276_v53 = vpop.permute.xlu1 %280 }
 0x198   :  { %v1223_v37 = vsel %vm1175_vm9, %v1199_v54, %v1079_v48  ;;  %v1319_v42 = vsel %vm1271_vm10, %v1295_v58, %v1103_v31  ;;  %v3282_v46 = vpop.permute.xlu0 %274 }
 0x199   :  { %v3263_v50 = vsel %vm101_vm12, %v1223_v37, %v1319_v42  ;;  %1391 = vrot.lane.b32.xlu0 %v1223_v37, %s1775_s22  ;;  %1426 = vrot.lane.b32.xlu1 %v2637_v60, %s1772_s20 }
 0x19a   :  { %4513 = vst [vmem:[#allocation48_spill] sm:$0xff] %v3263_v50  ;;  %v3288_v24 = vpop.permute.xlu1 %284 }
 0x19c   :  { %v3290_v32 = vpop.permute.xlu0 %278 }
 0x19d   :  { %1420 = vrot.lane.b32.xlu0 %v4514_v21, %s1772_s20  ;;  %1430 = vrot.lane.b32.xlu1 %v2706_v62, %s1772_s20 }
 0x19e   :  { %v3296_v57 = vpop.permute.xlu1 %288 }
 0x1a0   :  { %v3302_v56 = vpop.permute.xlu0 %282 }
 0x1a1   :  { %1424 = vrot.lane.b32.xlu0 %v2665_v13, %s1772_s20  ;;  %1434 = vrot.lane.b32.xlu1 %v2755_v39, %s1772_s20 }
 0x1a2   :  { %v3308_v7 = vpop.permute.xlu1 %292 }
 0x1a4   :  { %v3310_v12 = vpop.permute.xlu0 %286 }
 0x1a5   :  { %1428 = vrot.lane.b32.xlu0 %v2736_v18, %s1772_s20  ;;  %1438 = vrot.lane.b32.xlu1 %v2812_v17, %s1772_s20 }
 0x1a6   :  { %v3316_v0 = vpop.permute.xlu1 %296 }
 0x1a7   :  { %4515 = vst [vmem:[#allocation47_spill] sm:$0xff] %v3316_v0 }
 0x1a8   :  { %v3320_v1 = vpop.permute.xlu0 %290 }
 0x1a9   :  { %1432 = vrot.lane.b32.xlu0 %v2786_v51, %s1772_s20  ;;  %1442 = vrot.lane.b32.xlu1 %v2877_v20, %s1772_s20  ;;  %4516 = vst [vmem:[#allocation37_spill] sm:$0xff] %v3320_v1  ;;  %v4576_v1 = vld [vmem:[#allocation35_spill] sm:$0xff] }
 0x1aa   :  { %v3328_v48 = vpop.permute.xlu1 %300 }
 0x1ab   :  { %4517 = vst [vmem:[#allocation49_spill] sm:$0xff] %v3328_v48  ;;  %v4564_v48 = vld [vmem:[#allocation16_spill] sm:$0xff] }
 0x1ac   :  { %v3330_v31 = vpop.permute.xlu0 %294 }
 0x1ad   :  { %1436 = vrot.lane.b32.xlu0 %v2845_v9, %s1772_s20  ;;  %1446 = vrot.lane.b32.xlu1 %v2940_v34, %s1772_s20  ;;  %4518 = vst [vmem:[#allocation12_spill] sm:$0xff] %v3330_v31 }
 0x1ae   :  { %v3335_v54 = vpop.permute.xlu1 %1349 }
 0x1af   :  { %4519 = vst [vmem:[#allocation54_spill] sm:$0xff] %v3335_v54 }
 0x1b0   :  { %v3339_v58 = vpop.permute.xlu0 %298 }
 0x1b1   :  { %1440 = vrot.lane.b32.xlu0 %v2911_v36, %s1772_s20  ;;  %1450 = vrot.lane.b32.xlu1 %v2991_v55, %s1772_s20  ;;  %4520 = vst [vmem:[#allocation55_spill] sm:$0xff] %v3339_v58 }
 0x1b2   :  { %v3341_v42 = vpop.permute.xlu1 %1353 }
 0x1b3   :  { %4521 = vst [vmem:[#allocation56_spill] sm:$0xff] %v3341_v42 }
 0x1b5   :  { %1444 = vrot.lane.b32.xlu0 %v2967_v8, %s1772_s20  ;;  %1454 = vrot.lane.b32.xlu1 %v3055_v25, %s1772_s20 }
 0x1b6   :  { %v3346_v50 = vpop.permute.xlu1 %1357 }
 0x1b7   :  { %4523 = vst [vmem:[#allocation58_spill] sm:$0xff] %v3346_v50 }
 0x1b9   :  { %1448 = vrot.lane.b32.xlu0 %v3009_v38, %s1772_s20  ;;  %1458 = vrot.lane.b32.xlu1 %v3121_v30, %s1772_s20 }
 0x1ba   :  { %v3350_v2 = vpop.permute.xlu1 %1361 }
 0x1bb   :  { %4525 = vst [vmem:[#allocation60_spill] sm:$0xff] %v3350_v2 }
 0x1bd   :  { %1452 = vrot.lane.b32.xlu0 %v3077_v28, %s1772_s20  ;;  %1462 = vrot.lane.b32.xlu1 %v3186_v23, %s1772_s20  ;;  %v3344_v23 = vpop.permute.xlu0 %1347 }
 0x1be   :  { %4522 = vst [vmem:[#allocation57_spill] sm:$0xff] %v3344_v23  ;;  %v3354_v4 = vpop.permute.xlu1 %1365 }
 0x1bf   :  { %4527 = vst [vmem:[#allocation62_spill] sm:$0xff] %v3354_v4 }
 0x1c1   :  { %1456 = vrot.lane.b32.xlu0 %v3145_v27, %s1772_s20  ;;  %1466 = vrot.lane.b32.xlu1 %v1226_v19, %s1772_s20  ;;  %v3348_v38 = vpop.permute.xlu0 %1351 }
 0x1c2   :  { %4524 = vst [vmem:[#allocation59_spill] sm:$0xff] %v3348_v38 }
 0x1c5   :  { %1460 = vrot.lane.b32.xlu0 %v3219_v16, %s1772_s20  ;;  %v3352_v19 = vpop.permute.xlu0 %1355  ;;  %v3358_v16 = vpop.permute.xlu1 %1369 }
 0x1c6   :  { %4526 = vst [vmem:[#allocation61_spill] sm:$0xff] %v3352_v19  ;;  %4529 = vst [vmem:[#allocation64_spill] sm:$0xff] %v3358_v16  ;;  %v4540_v16 = vld [vmem:[#allocation53_spill] sm:$0xff] }
 0x1c9   :  { %1464 = vrot.lane.b32.xlu0 %v1223_v37, %s1772_s20  ;;  %v3356_v54 = vpop.permute.xlu0 %1359  ;;  %v3362_v42 = vpop.permute.xlu1 %1373 }
 0x1ca   :  { %4528 = vst [vmem:[#allocation63_spill] sm:$0xff] %v3356_v54  ;;  %4531 = vst [vmem:[#allocation66_spill] sm:$0xff] %v3362_v42  ;;  %v4539_v54 = vld [vmem:[#allocation9_spill] sm:$0xff]  ;;  %v3383_v42 = vsel %vm99_vm4, %v2583_v26, %v4540_v16  ;;  %v3407_v26 = vsel %vm99_vm4, %v2706_v62, %v2710_v49  ;;  %v3436_v62 = vsel %vm99_vm4, %v2786_v51, %v2790_v6  ;;  %v4552_v49 = vld [vmem:[#allocation24_spill] sm:$0xff] }
 0x1cb   :  { %vm229_vm13 = vcmp.lt.s32.totalorder %v4539_v54, 1  ;;  %4542 = vst [vmem:[#allocation9_spill] sm:$0xff] %v3383_v42  ;;  %4547 = vst [vmem:[#allocation74_spill] sm:$0xff] %v3407_v26  ;;  %vm302_vm14 = vcmp.lt.s32.totalorder %v4539_v54, 2  ;;  %v4554_v16 = vld [vmem:[#allocation41_spill] sm:$0xff]  ;;  %v4559_v6 = vld [vmem:[#allocation51_spill] sm:$0xff] }
 0x1cc   :  { %4551 = vst [vmem:[#allocation78_spill] sm:$0xff] %v3436_v62  ;;  %v4574_v42 = vld [vmem:[#allocation27_spill] sm:$0xff]  ;;  %vm1395_vm2 = vcmp.lt.s32.totalorder %v4539_v54, 126 }
 0x1cd   :  { %v3360_v58 = vpop.permute.xlu0 %1363  ;;  %v3366_v23 = vpop.permute.xlu1 %1377 }
 0x1ce   :  { %4530 = vst [vmem:[#allocation65_spill] sm:$0xff] %v3360_v58  ;;  %4533 = vst [vmem:[#allocation68_spill] sm:$0xff] %v3366_v23  ;;  %v4541_v58 = vld [vmem:[#allocation10_spill] sm:$0xff]  ;;  %v4560_v23 = vld [vmem:[#allocation15_spill] sm:$0xff] }
 0x1cf   :  { %v243_v62 = vsel %vm229_vm13, %v4560_v23, %v4559_v6  ;;  %vm102_vm1 = vcmp.eq.s32.totalorder %v4541_v58, 1  ;;  %vm105_vm5 = vcmp.eq.s32.totalorder %v4541_v58, 2 }
 0x1d1   :  { %v3364_v37 = vpop.permute.xlu0 %1367 }
 0x1d2   :  { %4532 = vst [vmem:[#allocation67_spill] sm:$0xff] %v3364_v37  ;;  %v4543_v37 = vld [vmem:[#allocation13_spill] sm:$0xff] }
 0x1d4   :  { %v3370_v38 = vpop.permute.xlu1 %1381 }
 0x1d5   :  { %v3368_v50 = vpop.permute.xlu0 %1371  ;;  %4535 = vst [vmem:[#allocation70_spill] sm:$0xff] %v3370_v38  ;;  %v4556_v38 = vld [vmem:[#allocation18_spill] sm:$0xff] }
 0x1d6   :  { %4534 = vst [vmem:[#allocation69_spill] sm:$0xff] %v3368_v50  ;;  %v3389_v50 = vsel %vm99_vm4, %v4514_v21, %v4543_v37  ;;  %v3413_v21 = vsel %vm99_vm4, %v2736_v18, %v2740_v29  ;;  %v4553_v18 = vld [vmem:[#allocation21_spill] sm:$0xff]  ;;  %v4555_v37 = vld [vmem:[#allocation8_spill] sm:$0xff] }
 0x1d7   :  { %4544 = vst [vmem:[#allocation53_spill] sm:$0xff] %v3389_v50  ;;  %4548 = vst [vmem:[#allocation75_spill] sm:$0xff] %v3413_v21  ;;  %v241_v29 = vsel %vm229_vm13, %v4553_v18, %v4552_v49  ;;  %v4562_v21 = vld [vmem:[#allocation22_spill] sm:$0xff] }
 0x1d8   :  { %v4573_v50 = vld [vmem:[#allocation46_spill] sm:$0xff] }
 0x1d9   :  { %v3372_v2 = vpop.permute.xlu0 %1375  ;;  %v3501_v0 = vsel %vm229_vm13, %v4574_v42, %v4573_v50 }
 0x1da   :  { %4536 = vst [vmem:[#allocation71_spill] sm:$0xff] %v3372_v2  ;;  %v4558_v2 = vld [vmem:[#allocation20_spill] sm:$0xff]  ;;  %4575 = vst [vmem:[#allocation18_spill] sm:$0xff] %v3501_v0  ;;  %v4578_v0 = vld [vmem:[#allocation31_spill] sm:$0xff] }
 0x1db   :  { %v1324_v51 = vsel %vm100_vm11, %v2845_v9, %v4558_v2  ;;  %v312_v2 = vsel %vm302_vm14, %v3157_v61, %v3255_v15 }
 0x1dd   :  { %v3376_v4 = vpop.permute.xlu0 %1379 }
 0x1de   :  { %4538 = vst [vmem:[#allocation73_spill] sm:$0xff] %v3376_v4  ;;  %v3401_v4 = vsel %vm99_vm4, %v2665_v13, %v2667_v52  ;;  %v3430_v52 = vsel %vm99_vm4, %v2755_v39, %v2757_v14  ;;  %v4557_v39 = vld [vmem:[#allocation11_spill] sm:$0xff]  ;;  %v1327_v14 = vsel %vm100_vm11, %v2812_v17, %v4556_v38  ;;  %v1333_v17 = vsel %vm100_vm11, %v2877_v20, %v4564_v48  ;;  %v4565_v38 = vld [vmem:[#allocation14_spill] sm:$0xff] }
 0x1df   :  { %4546 = vst [vmem:[#allocation13_spill] sm:$0xff] %v3401_v4  ;;  %4550 = vst [vmem:[#allocation77_spill] sm:$0xff] %v3430_v52  ;;  %v4561_v52 = vld [vmem:[#allocation30_spill] sm:$0xff]  ;;  %v3474_v9 = vsel %vm100_vm11, %v2911_v36, %v4565_v38  ;;  %vm103_vm15 = vcmp.eq.s32.totalorder %v4557_v39, 1  ;;  %v4569_v20 = vld [vmem:[#allocation23_spill] sm:$0xff]  ;;  %vm106_vm6 = vcmp.eq.s32.totalorder %v4557_v39, 2 }
 0x1e0   :  { %v3462_v26 = vsel %vm229_vm13, %v4562_v21, %v4561_v52  ;;  %4566 = vst [vmem:[#allocation21_spill] sm:$0xff] %v3474_v9  ;;  %v3491_v48 = vsel %vm100_vm11, %v2967_v8, %v4569_v20  ;;  %v4571_v36 = vld [vmem:[#allocation29_spill] sm:$0xff]  ;;  %v4572_v38 = vld [vmem:[#allocation19_spill] sm:$0xff]  ;;  %v247_v8 = vsel %vm229_vm13, %v4576_v1, %v2891_v44 }
 0x1e1   :  { %4570 = vst [vmem:[#allocation8_spill] sm:$0xff] %v3491_v48  ;;  %v245_v31 = vsel %vm229_vm13, %v4572_v38, %v4571_v36  ;;  %v311_v48 = vsel %vm302_vm14, %v3201_v33, %v3270_v11 }
 0x1e3   :  { %v3374_v19 = vpop.permute.xlu1 %1385 }
 0x1e4   :  { %4537 = vst [vmem:[#allocation72_spill] sm:$0xff] %v3374_v19  ;;  %v3395_v19 = vsel %vm99_vm4, %v2637_v60, %v2639_v63  ;;  %v239_v60 = vsel %vm229_vm13, %v2891_v44, %v2980_v40  ;;  %v238_v63 = vsel %vm229_vm13, %v2927_v3, %v3003_v45 }
 0x1e5   :  { %4545 = vst [vmem:[#allocation10_spill] sm:$0xff] %v3395_v19  ;;  %v4567_v19 = vld [vmem:[#allocation17_spill] sm:$0xff] }
 0x1eb   :  { %v3464_v4 = vpop.permute.xlu0 %1383 }
 0x1ec   :  { %4563 = vst [vmem:[#allocation24_spill] sm:$0xff] %v3464_v4  ;;  %v3485_v4 = vsel %vm100_vm11, %v2940_v34, %v4567_v19  ;;  %v231_v34 = vsel %vm229_vm13, %v2980_v40, %v4576_v1  ;;  %v4577_v19 = vld [vmem:[#allocation45_spill] sm:$0xff]  ;;  %v3525_v40 = vsel %vm100_vm11, %v2991_v55, %v4578_v0  ;;  %v4581_v0 = vld [vmem:[#allocation26_spill] sm:$0xff] }
 0x1ed   :  { %4568 = vst [vmem:[#allocation41_spill] sm:$0xff] %v3485_v4  ;;  %v3515_v20 = vsel %vm229_vm13, %v3003_v45, %v4577_v19  ;;  %v246_v44 = vsel %vm229_vm13, %v4577_v19, %v2927_v3  ;;  %v4579_v1 = vld [vmem:[#allocation33_spill] sm:$0xff]  ;;  %v337_v4 = vsel %vm103_vm15, %v239_v60, %v312_v2  ;;  %v3549_v3 = vsel %vm229_vm13, %v4554_v16, %v4581_v0  ;;  %v4582_v2 = vld [vmem:[#allocation52_spill] sm:$0xff]  ;;  %v4583_v19 = vld [vmem:[#allocation50_spill] sm:$0xff] }
 0x1ee   :  { %v233_v45 = vsel %vm229_vm13, %v4552_v49, %v4579_v1  ;;  %v3543_v55 = vsel %vm229_vm13, %v4579_v1, %v4553_v18  ;;  %v3555_v49 = vsel %vm229_vm13, %v4581_v0, %v4555_v37  ;;  %v314_v60 = vsel %vm302_vm14, %v3182_v59, %v3268_v47  ;;  %v4584_v1 = vld [vmem:[#allocation36_spill] sm:$0xff] }
 0x1ef   :  { %v3565_v18 = vsel %vm101_vm12, %v3055_v25, %v4582_v2  ;;  %v334_v0 = vsel %vm103_vm15, %v238_v63, %v311_v48  ;;  %v3587_v25 = vsel %vm229_vm13, %v4584_v1, %v4560_v23  ;;  %v4586_v2 = vld [vmem:[#allocation38_spill] sm:$0xff]  ;;  %v313_v63 = vsel %vm302_vm14, %v3224_v22, %v3282_v46  ;;  %v4588_v48 = vld [vmem:[#allocation39_spill] sm:$0xff] }
 0x1f0   :  { %v3605_v23 = vsel %vm101_vm12, %v3121_v30, %v4588_v48  ;;  %v1698_v48 = vld [vmem:[#allocation2 + $0x8] sm:$0xff] }
 0x1f5   :  { %v3424_v13 = vpop.permute.xlu1 %1389 }
 0x1f6   :  { %4549 = vst [vmem:[#allocation76_spill] sm:$0xff] %v3424_v13  ;;  %v240_v13 = vsel %vm229_vm13, %v4555_v37, %v4554_v16  ;;  %v3571_v16 = vsel %vm101_vm12, %v3077_v28, %v4583_v19  ;;  %v3577_v37 = vsel %vm229_vm13, %v4559_v6, %v4584_v1  ;;  %v3593_v28 = vsel %vm229_vm13, %v4561_v52, %v4586_v2  ;;  %v1697_v19 = vld [vmem:[#allocation2 + $0x20] sm:$0xff] }
 0x1f7   :  { %4587 = vst [vmem:[#allocation51_spill] sm:$0xff] %v3593_v28  ;;  %v367_v6 = vsel %vm100_vm11, %v1697_v19, %v337_v4  ;;  %v4589_v1 = vld [vmem:[#allocation28_spill] sm:$0xff]  ;;  %v3617_v4 = vsel %vm229_vm13, %v4586_v2, %v4562_v21  ;;  %v343_v19 = vsel %vm103_vm15, %v241_v29, %v314_v60  ;;  %v364_v21 = vsel %vm100_vm11, %v1698_v48, %v334_v0  ;;  %v4591_v60 = vld [vmem:[#allocation43_spill] sm:$0xff] }
 0x1f8   :  { %v3611_v52 = vsel %vm101_vm12, %v3145_v27, %v4589_v1  ;;  %v4590_v28 = vld [vmem:[#allocation40_spill] sm:$0xff]  ;;  %v316_v29 = vsel %vm302_vm14, %v3214_v41, %v3276_v53  ;;  %v3653_v2 = vmul.f32 %v1327_v14, %v367_v6  ;;  %v340_v0 = vsel %vm103_vm15, %v240_v13, %v313_v63 }
 0x1f9   :  { %v3627_v30 = vsel %vm229_vm13, %v4571_v36, %v4590_v28  ;;  %v3633_v27 = vsel %vm229_vm13, %v4590_v28, %v4572_v38  ;;  %v3645_v36 = vsel %vm229_vm13, %v4573_v50, %v4591_v60  ;;  %v3651_v38 = vsel %vm229_vm13, %v4591_v60, %v4574_v42  ;;  %v1699_v28 = vld [vmem:[#allocation2 + $0x50] sm:$0xff]  ;;  %v1701_v60 = vld [vmem:[#allocation2 + $0x80] sm:$0xff] }
 0x1fa   :  { %v373_v1 = vsel %vm100_vm11, %v1699_v28, %v343_v19  ;;  %v318_v50 = vsel %vm302_vm14, %v3242_v35, %v3288_v24  ;;  %v304_v42 = vsel %vm302_vm14, %v3255_v15, %v3296_v57  ;;  %v3668_v14 = vmul.f32 %v1324_v51, %v364_v21 }
 0x1fb   :  { %v349_v13 = vsel %vm103_vm15, %v243_v62, %v316_v29  ;;  %v315_v6 = vsel %vm302_vm14, %v3245_v10, %v3290_v32  ;;  %v320_v15 = vsel %vm302_vm14, %v3296_v57, %v3157_v61  ;;  %v303_v62 = vsel %vm302_vm14, %v3270_v11, %v3310_v12  ;;  %v1700_v29 = vld [vmem:[#allocation2 + $0x38] sm:$0xff] }
 0x1fc   :  { %v319_v51 = vsel %vm302_vm14, %v3310_v12, %v3201_v33  ;;  %v306_v48 = vsel %vm302_vm14, %v3268_v47, %v3308_v7  ;;  %v3697_v21 = vmul.f32 %v1333_v17, %v373_v1  ;;  %v370_v61 = vsel %vm100_vm11, %v1700_v29, %v340_v0 }
 0x1fd   :  { %v355_v57 = vsel %vm103_vm15, %v245_v31, %v318_v50  ;;  %v338_v11 = vsel %vm104_vm0, %v231_v34, %v304_v42  ;;  %v379_v33 = vsel %vm100_vm11, %v1701_v60, %v349_v13  ;;  %v346_v47 = vsel %vm103_vm15, %v3462_v26, %v315_v6  ;;  %v4593_v50 = vld [vmem:[#allocation21_spill] sm:$0xff]  ;;  %v1707_v60 = vld [vmem:[#allocation2 + $0x10] sm:$0xff] }
 0x1fe   :  { %v317_v12 = vsel %vm302_vm14, %v3259_v5, %v3302_v56  ;;  %v322_v31 = vsel %vm302_vm14, %v3308_v7, %v3182_v59  ;;  %v336_v17 = vsel %vm102_vm1, %v247_v8, %v320_v15  ;;  %v333_v34 = vsel %vm102_vm1, %v246_v44, %v319_v51  ;;  %v1702_v59 = vld [vmem:[#allocation2 + $0xb0] sm:$0xff]  ;;  %v1703_v8 = vld [vmem:[#allocation2 + $0x28] sm:$0xff] }
 0x1ff   :  { %v335_v26 = vsel %vm104_vm0, %v3515_v20, %v303_v62  ;;  %v344_v0 = vsel %vm104_vm0, %v233_v45, %v306_v48  ;;  %v3732_v42 = vmul.f32 %v4593_v50, %v370_v61  ;;  %v385_v7 = vsel %vm100_vm11, %v1702_v59, %v355_v57  ;;  %v4594_v20 = vld [vmem:[#allocation37_spill] sm:$0xff]  ;;  %v4596_v51 = vld [vmem:[#allocation18_spill] sm:$0xff]  ;;  %v1705_v61 = vld [vmem:[#allocation2 + $0x18] sm:$0xff] }
 0x200   :  { %v368_v44 = vsel %vm101_vm12, %v1703_v8, %v338_v11  ;;  %v321_v45 = vsel %vm302_vm14, %v4594_v20, %v3224_v22  ;;  %v4595_v13 = vld [vmem:[#allocation41_spill] sm:$0xff]  ;;  %v3752_v48 = vsel %vm103_vm15, %v4596_v51, %v317_v12  ;;  %v342_v29 = vsel %vm102_vm1, %v3543_v55, %v322_v31  ;;  %v1706_v57 = vld [vmem:[#allocation2] sm:$0xff]  ;;  %v4598_v59 = vld [vmem:[#allocation47_spill] sm:$0xff] }
 0x201   :  { %v3743_v6 = vmul.f32 %v4595_v13, %v379_v33  ;;  %v1704_v15 = vld [vmem:[#allocation2 + $0x68] sm:$0xff]  ;;  %4597 = vst [vmem:[#allocation30_spill] sm:$0xff] %v3752_v48  ;;  %v366_v22 = vsel %vm99_vm4, %v1705_v61, %v336_v17  ;;  %v363_v11 = vsel %vm99_vm4, %v1706_v57, %v333_v34  ;;  %v365_v33 = vsel %vm101_vm12, %v1707_v60, %v335_v26  ;;  %v1710_v13 = vld [vmem:[#allocation2 + $0x30] sm:$0xff] }
 0x202   :  { %v3747_v62 = vsel %vm100_vm11, %v1704_v15, %v346_v47  ;;  %v1708_v47 = vld [vmem:[#allocation2 + $0x58] sm:$0xff]  ;;  %v3766_v50 = vmul.f32 %v3525_v40, %v385_v7  ;;  %v3769_v55 = vmul.f32 %v3565_v18, %v368_v44  ;;  %v305_v31 = vsel %vm302_vm14, %v3282_v46, %v4594_v20  ;;  %v4600_v8 = vld [vmem:[#allocation53_spill] sm:$0xff]  ;;  %v4601_v15 = vld [vmem:[#allocation12_spill] sm:$0xff] }
 0x203   :  { %v3537_v9 = vpop.permute.xlu1 %1393  ;;  %v374_v12 = vsel %vm101_vm12, %v1708_v47, %v344_v0  ;;  %v339_v17 = vsel %vm102_vm1, %v3555_v49, %v321_v45  ;;  %v1709_v0 = vld [vmem:[#allocation2 + $0x48] sm:$0xff]  ;;  %v308_v18 = vsel %vm302_vm14, %v3276_v53, %v4598_v59  ;;  %v324_v46 = vsel %vm302_vm14, %v4598_v59, %v3214_v41  ;;  %v4605_v60 = vld [vmem:[#allocation54_spill] sm:$0xff]  ;;  %v1711_v47 = vld [vmem:[#allocation2 + $0x40] sm:$0xff] }
 0x204   :  { %4580 = vst [vmem:[#allocation11_spill] sm:$0xff] %v3537_v9  ;;  %v3581_v9 = vpop.permute.xlu0 %1387  ;;  %v372_v40 = vsel %vm99_vm4, %v1709_v0, %v342_v29  ;;  %v4599_v49 = vld [vmem:[#allocation9_spill] sm:$0xff]  ;;  %v3795_v44 = vmul.f32 %v4600_v8, %v363_v11  ;;  %v3798_v20 = vmul.f32 %v3571_v16, %v365_v33  ;;  %v3801_v45 = vmul.f32 %v3605_v23, %v374_v12  ;;  %v4602_v16 = vld [vmem:[#allocation10_spill] sm:$0xff]  ;;  %v1712_v0 = vld [vmem:[#allocation2 + $0x78] sm:$0xff] }
 0x205   :  { %4585 = vst [vmem:[#allocation20_spill] sm:$0xff] %v3581_v9  ;;  %v1549_v7 = vmul.f32 %v4599_v49, %v366_v22  ;;  %v341_v53 = vsel %vm104_vm0, %v3549_v3, %v305_v31  ;;  %v369_v41 = vsel %vm99_vm4, %v1710_v13, %v339_v17  ;;  %v323_v51 = vsel %vm302_vm14, %v4601_v15, %v3245_v10  ;;  %v4603_v57 = vld [vmem:[#allocation49_spill] sm:$0xff] }
 0x206   :  { %v1555_v29 = vmul.f32 %v4602_v16, %v372_v40  ;;  %v348_v23 = vsel %vm102_vm1, %v3587_v25, %v324_v46  ;;  %v350_v3 = vsel %vm104_vm0, %v3577_v37, %v308_v18  ;;  %v307_v61 = vsel %vm302_vm14, %v3290_v32, %v4601_v15  ;;  %v4604_v37 = vld [vmem:[#allocation62_spill] sm:$0xff]  ;;  %v1713_v59 = vld [vmem:[#allocation2 + $0x88] sm:$0xff]  ;;  %v4607_v46 = vld [vmem:[#allocation55_spill] sm:$0xff] }
 0x207   :  { %v3621_v9 = vpop.permute.xlu1 %1422  ;;  %v310_v11 = vsel %vm302_vm14, %v3288_v24, %v4603_v57  ;;  %v326_v25 = vsel %vm302_vm14, %v4603_v57, %v3242_v35  ;;  %v1405_v33 = vsel %vm1395_vm2, %v4605_v60, %v4604_v37  ;;  %v371_v12 = vsel %vm101_vm12, %v1711_v47, %v341_v53  ;;  %v4606_v24 = vld [vmem:[#allocation13_spill] sm:$0xff]  ;;  %v4610_v57 = vld [vmem:[#allocation56_spill] sm:$0xff]  ;;  %v1715_v47 = vld [vmem:[#allocation2 + $0x70] sm:$0xff] }
 0x208   :  { %v3847_v31 = vmul.f32 %v4606_v24, %v369_v41  ;;  %v345_v35 = vsel %vm102_vm1, %v3617_v4, %v323_v51  ;;  %v378_v40 = vsel %vm99_vm4, %v1712_v0, %v348_v23  ;;  %v380_v18 = vsel %vm101_vm12, %v1713_v59, %v350_v3  ;;  %v4608_v4 = vld [vmem:[#allocation51_spill] sm:$0xff]  ;;  %v1714_v23 = vld [vmem:[#allocation2 + $0x60] sm:$0xff]  ;;  %v1716_v24 = vld [vmem:[#allocation2 + $0xa8] sm:$0xff] }
 0x209   :  { %v325_v49 = vsel %vm302_vm14, %v4607_v46, %v3259_v5  ;;  %v347_v53 = vsel %vm104_vm0, %v4608_v4, %v307_v61  ;;  %v354_v13 = vsel %vm102_vm1, %v3633_v27, %v326_v25  ;;  %v356_v41 = vsel %vm104_vm0, %v3627_v30, %v310_v11  ;;  %v4609_v61 = vld [vmem:[#allocation64_spill] sm:$0xff]  ;;  %v4612_v25 = vld [vmem:[#allocation42_spill] sm:$0xff] }
 0x20a   :  { %v3878_v5 = vmul.f32 %v3611_v52, %v371_v12  ;;  %v375_v3 = vsel %vm99_vm4, %v1714_v23, %v345_v35  ;;  %v1407_v27 = vsel %vm1395_vm2, %v4610_v57, %v4609_v61  ;;  %v351_v52 = vsel %vm102_vm1, %v3651_v38, %v325_v49  ;;  %v4615_v49 = vld [vmem:[#allocation65_spill] sm:$0xff] }
 0x20b   :  { %v3677_v63 = vpop.permute.xlu0 %1391  ;;  %v3679_v19 = vpop.permute.xlu1 %1426  ;;  %v3901_v12 = vsel %vm101_vm12, %v1715_v47, %v347_v53  ;;  %v384_v35 = vsel %vm99_vm4, %v1716_v24, %v354_v13 }
 0x20c   :  { %4592 = vst [vmem:[#allocation15_spill] sm:$0xff] %v3677_v63  ;;  %4613 = vst [vmem:[#allocation22_spill] sm:$0xff] %v3901_v12 }
 0x20f   :  { %v3727_v28 = vpop.permute.xlu0 %1420  ;;  %v3729_v1 = vpop.permute.xlu1 %1430 }
 0x213   :  { %v3778_v34 = vpop.permute.xlu0 %1424  ;;  %v3780_v26 = vpop.permute.xlu1 %1434 }
 0x217   :  { %v3824_v22 = vpop.permute.xlu0 %1428  ;;  %v3826_v10 = vpop.permute.xlu1 %1438 }
 0x218   :  { %v1477_v32 = vsel %vm156_vm3, %v3621_v9, %v3826_v10 }
 0x219   :  { %v1495_v17 = vsel %vm99_vm4, %v1405_v33, %v1477_v32  ;;  %v3892_v33 = vmul.f32 %v4612_v25, %v380_v18  ;;  %v309_v18 = vsel %vm302_vm14, %v3302_v56, %v4607_v46  ;;  %v4619_v46 = vld [vmem:[#allocation77_spill] sm:$0xff]  ;;  %v4620_v25 = vld [vmem:[#allocation34_spill] sm:$0xff] }
 0x21a   :  { %v1525_v8 = vsel %vm105_vm5, 1.0, %v1495_v17  ;;  %v1717_v17 = vld [vmem:[#allocation2 + $0xb8] sm:$0xff]  ;;  %v3947_v24 = vsel %vm104_vm0, %v3645_v36, %v309_v18 }
 0x21b   :  { %v3873_v15 = vpop.permute.xlu0 %1432  ;;  %v1573_v51 = vmul.f32 %v1549_v7, %v1525_v8  ;;  %v3875_v16 = vpop.permute.xlu1 %1442  ;;  %v4611_v7 = vld [vmem:[#allocation74_spill] sm:$0xff]  ;;  %v386_v0 = vsel %vm101_vm12, %v1717_v17, %v356_v41  ;;  %v4616_v8 = vld [vmem:[#allocation57_spill] sm:$0xff]  ;;  %4621 = vst [vmem:[#allocation16_spill] sm:$0xff] %v3947_v24  ;;  %v4622_v17 = vld [vmem:[#allocation67_spill] sm:$0xff] }
 0x21c   :  { %v1479_v30 = vsel %vm156_vm3, %v3679_v19, %v3875_v16  ;;  %v1561_v11 = vmul.f32 %v4611_v7, %v378_v40  ;;  %v4614_v40 = vld [vmem:[#allocation75_spill] sm:$0xff]  ;;  %v1404_v4 = vsel %vm1395_vm2, %v4616_v8, %v4615_v49  ;;  %v1718_v41 = vld [vmem:[#allocation2 + $0x90] sm:$0xff]  ;;  %v1567_v7 = vmul.f32 %v4619_v46, %v384_v35 }
 0x21d   :  { %1597 = vst [vmem:[#allocation5 + $0x18] sm:$0xff] %v1573_v51  ;;  %v1501_v32 = vsel %vm99_vm4, %v1407_v27, %v1479_v30  ;;  %v1558_v59 = vmul.f32 %v4614_v40, %v375_v3  ;;  %v381_v23 = vsel %vm99_vm4, %v1718_v41, %v351_v52  ;;  %v4617_v3 = vld [vmem:[#allocation66_spill] sm:$0xff] }
 0x21e   :  { %v1531_v38 = vsel %vm105_vm5, 1.0, %v1501_v32  ;;  %v4618_v27 = vld [vmem:[#allocation58_spill] sm:$0xff]  ;;  %v3938_v32 = vmul.f32 %v4620_v25, %v386_v0  ;;  %v4628_v25 = vld [vmem:[#allocation61_spill] sm:$0xff] }
 0x21f   :  { %v3918_v53 = vpop.permute.xlu0 %1436  ;;  %v1579_v13 = vmul.f32 %v1555_v29, %v1531_v38  ;;  %v3920_v51 = vpop.permute.xlu1 %1446  ;;  %v1409_v30 = vsel %vm1395_vm2, %v4618_v27, %v4617_v3  ;;  %v4623_v38 = vld [vmem:[#allocation59_spill] sm:$0xff]  ;;  %v4631_v24 = vld [vmem:[#allocation70_spill] sm:$0xff] }
 0x220   :  { %v1476_v56 = vsel %vm156_vm3, %v3727_v28, %v3918_v53  ;;  %v1481_v29 = vsel %vm156_vm3, %v3729_v1, %v3920_v51  ;;  %v1406_v35 = vsel %vm1395_vm2, %v4623_v38, %v4622_v17  ;;  %v1397_v48 = vsel %vm1395_vm2, %v4604_v37, %v4631_v24 }
 0x221   :  { %v1492_v52 = vsel %vm99_vm4, %v1404_v4, %v1476_v56  ;;  %1603 = vst [vmem:[#allocation5 + $0x48] sm:$0xff] %v1579_v13  ;;  %v1507_v47 = vsel %vm99_vm4, %v1409_v30, %v1481_v29  ;;  %v4624_v4 = vld [vmem:[#allocation78_spill] sm:$0xff]  ;;  %v4625_v56 = vld [vmem:[#allocation68_spill] sm:$0xff]  ;;  %v1413_v12 = vsel %vm1395_vm2, %v4631_v24, %v4605_v60 }
 0x222   :  { %v1522_v0 = vsel %vm105_vm5, 1.0, %v1492_v52  ;;  %v1537_v40 = vsel %vm105_vm5, 1.0, %v1507_v47  ;;  %v3958_v13 = vmul.f32 %v4624_v4, %v381_v23  ;;  %v4626_v29 = vld [vmem:[#allocation60_spill] sm:$0xff]  ;;  %v4629_v47 = vld [vmem:[#allocation71_spill] sm:$0xff] }
 0x223   :  { %v1570_v41 = vmul.f32 %v3795_v44, %v1522_v0  ;;  %v3961_v30 = vpop.permute.xlu0 %1440  ;;  %v1585_v36 = vmul.f32 %v1561_v11, %v1537_v40  ;;  %v3963_v18 = vpop.permute.xlu1 %1450  ;;  %v1411_v46 = vsel %vm1395_vm2, %v4626_v29, %v4625_v56  ;;  %v4627_v11 = vld [vmem:[#allocation69_spill] sm:$0xff]  ;;  %v4630_v0 = vld [vmem:[#allocation63_spill] sm:$0xff] }
 0x224   :  { %v1478_v23 = vsel %vm156_vm3, %v3778_v34, %v3961_v30  ;;  %v1483_v44 = vsel %vm156_vm3, %v3780_v26, %v3963_v18  ;;  %v1408_v52 = vsel %vm1395_vm2, %v4628_v25, %v4627_v11  ;;  %v1410_v40 = vsel %vm1395_vm2, %v4630_v0, %v4629_v47 }
 0x225   :  { %1594 = vst [vmem:[#allocation5] sm:$0xff] %v1570_v41  ;;  %v1498_v4 = vsel %vm99_vm4, %v1406_v35, %v1478_v23  ;;  %1609 = vst [vmem:[#allocation5 + $0x78] sm:$0xff] %v1585_v36  ;;  %v1513_v63 = vsel %vm99_vm4, %v1411_v46, %v1483_v44  ;;  %v4632_v36 = vld [vmem:[#allocation73_spill] sm:$0xff] }
 0x226   :  { %v1528_v41 = vsel %vm105_vm5, 1.0, %v1498_v4  ;;  %v1543_v35 = vsel %vm105_vm5, 1.0, %v1513_v63  ;;  %v1396_v46 = vsel %vm1395_vm2, %v4615_v49, %v4632_v36  ;;  %v1412_v37 = vsel %vm1395_vm2, %v4632_v36, %v4616_v8  ;;  %v4633_v4 = vld [vmem:[#allocation72_spill] sm:$0xff] }
 0x227   :  { %v1576_v23 = vmul.f32 %v3847_v31, %v1528_v41  ;;  %v4012_v44 = vpop.permute.xlu0 %1444  ;;  %v1591_v60 = vmul.f32 %v1567_v7, %v1543_v35  ;;  %v1455_v24 = vpop.permute.xlu1 %1454  ;;  %v1399_v63 = vsel %vm1395_vm2, %v4609_v61, %v4633_v4  ;;  %v1415_v7 = vsel %vm1395_vm2, %v4633_v4, %v4610_v57  ;;  %v4634_v35 = vld [vmem:[#allocation24_spill] sm:$0xff] }
 0x228   :  { %v1480_v49 = vsel %vm156_vm3, %v3824_v22, %v4012_v44  ;;  %v1469_v8 = vsel %vm156_vm3, %v3826_v10, %v1455_v24  ;;  %v1485_v31 = vsel %vm156_vm3, %v1455_v24, %v3621_v9  ;;  %v1398_v9 = vsel %vm1395_vm2, %v4622_v17, %v4634_v35  ;;  %v4635_v4 = vld [vmem:[#allocation76_spill] sm:$0xff] }
 0x229   :  { %1600 = vst [vmem:[#allocation5 + $0x30] sm:$0xff] %v1576_v23  ;;  %v1504_v61 = vsel %vm99_vm4, %v1408_v52, %v1480_v49  ;;  %1615 = vst [vmem:[#allocation5 + $0xa8] sm:$0xff] %v1591_v60  ;;  %v1496_v41 = vsel %vm100_vm11, %v1397_v48, %v1469_v8  ;;  %v1497_v10 = vsel %vm101_vm12, %v1413_v12, %v1485_v31  ;;  %v4636_v31 = vld [vmem:[#allocation11_spill] sm:$0xff] }
 0x22a   :  { %v1534_v36 = vsel %vm105_vm5, 1.0, %v1504_v61  ;;  %v1526_v57 = vsel %vm106_vm6, 1.0, %v1496_v41  ;;  %v1527_v52 = vsel %vm107_vm7, 1.0, %v1497_v10  ;;  %v1414_v48 = vsel %vm1395_vm2, %v4634_v35, %v4623_v38 }
 0x22b   :  { %v1582_v12 = vmul.f32 %v1558_v59, %v1534_v36  ;;  %v4052_v23 = vpop.permute.xlu0 %1448  ;;  %v1574_v60 = vmul.f32 %v3653_v2, %v1526_v57  ;;  %v1575_v17 = vmul.f32 %v3769_v55, %v1527_v52  ;;  %v1459_v24 = vpop.permute.xlu1 %1458  ;;  %v1401_v49 = vsel %vm1395_vm2, %v4617_v3, %v4635_v4 }
 0x22c   :  { %v1482_v8 = vsel %vm156_vm3, %v3873_v15, %v4052_v23  ;;  %v1471_v59 = vsel %vm156_vm3, %v3875_v16, %v1459_v24  ;;  %v1487_v2 = vsel %vm156_vm3, %v1459_v24, %v3679_v19  ;;  %v1417_v55 = vsel %vm1395_vm2, %v4635_v4, %v4618_v27 }
 0x22d   :  { %1606 = vst [vmem:[#allocation5 + $0x60] sm:$0xff] %v1582_v12  ;;  %v1510_v3 = vsel %vm99_vm4, %v1410_v40, %v1482_v8  ;;  %1598 = vst [vmem:[#allocation5 + $0x20] sm:$0xff] %v1574_v60  ;;  %v1502_v38 = vsel %vm100_vm11, %v1399_v63, %v1471_v59  ;;  %v1503_v16 = vsel %vm101_vm12, %v1415_v7, %v1487_v2 }
 0x22e   :  { %1599 = vst [vmem:[#allocation5 + $0x28] sm:$0xff] %v1575_v17  ;;  %v1403_v19 = vsel %vm1395_vm2, %v4625_v56, %v4636_v31  ;;  %v1540_v27 = vsel %vm105_vm5, 1.0, %v1510_v3  ;;  %v1532_v61 = vsel %vm106_vm6, 1.0, %v1502_v38  ;;  %v1533_v40 = vsel %vm107_vm7, 1.0, %v1503_v16  ;;  %v4637_v38 = vld [vmem:[#allocation20_spill] sm:$0xff] }
 0x22f   :  { %v1419_v63 = vsel %vm1395_vm2, %v4636_v31, %v4626_v29  ;;  %v1588_v7 = vmul.f32 %v3958_v13, %v1540_v27  ;;  %v1453_v41 = vpop.permute.xlu0 %1452  ;;  %v1580_v10 = vmul.f32 %v3697_v21, %v1532_v61  ;;  %v1581_v56 = vmul.f32 %v3801_v45, %v1533_v40  ;;  %v1463_v58 = vpop.permute.xlu1 %1462  ;;  %v4640_v27 = vld [vmem:[#allocation44_spill] sm:$0xff]  ;;  %v4641_v40 = vld [vmem:[#allocation30_spill] sm:$0xff] }
 0x230   :  { %v1468_v35 = vsel %vm156_vm3, %v3918_v53, %v1453_v41  ;;  %v1484_v36 = vsel %vm156_vm3, %v1453_v41, %v3727_v28  ;;  %v1473_v29 = vsel %vm156_vm3, %v3920_v51, %v1463_v58  ;;  %v1489_v13 = vsel %vm156_vm3, %v1463_v58, %v3729_v1  ;;  %v4644_v58 = vld [vmem:[#allocation32_spill] sm:$0xff] }
 0x231   :  { %1612 = vst [vmem:[#allocation5 + $0x90] sm:$0xff] %v1588_v7  ;;  %v1493_v21 = vsel %vm100_vm11, %v1396_v46, %v1468_v35  ;;  %v1494_v45 = vsel %vm101_vm12, %v1412_v37, %v1484_v36  ;;  %1604 = vst [vmem:[#allocation5 + $0x50] sm:$0xff] %v1580_v10  ;;  %v1508_v28 = vsel %vm100_vm11, %v1401_v49, %v1473_v29 }
 0x232   :  { %1605 = vst [vmem:[#allocation5 + $0x58] sm:$0xff] %v1581_v56  ;;  %v1509_v53 = vsel %vm101_vm12, %v1417_v55, %v1489_v13  ;;  %v1523_v51 = vsel %vm106_vm6, 1.0, %v1493_v21  ;;  %v1524_v1 = vsel %vm107_vm7, 1.0, %v1494_v45  ;;  %v1538_v46 = vsel %vm106_vm6, 1.0, %v1508_v28  ;;  %v4643_v56 = vld [vmem:[#allocation25_spill] sm:$0xff]  ;;  %v4645_v21 = vld [vmem:[#allocation15_spill] sm:$0xff] }
 0x233   :  { %v1539_v37 = vsel %vm107_vm7, 1.0, %v1509_v53  ;;  %v1571_v57 = vmul.f32 %v3668_v14, %v1523_v51  ;;  %v1572_v52 = vmul.f32 %v3798_v20, %v1524_v1  ;;  %v1457_v12 = vpop.permute.xlu0 %1456  ;;  %v1586_v60 = vmul.f32 %v3743_v6, %v1538_v46  ;;  %v1467_v24 = vpop.permute.xlu1 %1466  ;;  %v4646_v46 = vld [vmem:[#allocation48_spill] sm:$0xff] }
 0x234   :  { %v1587_v17 = vmul.f32 %v3892_v33, %v1539_v37  ;;  %v1470_v4 = vsel %vm156_vm3, %v3961_v30, %v1457_v12  ;;  %v1486_v49 = vsel %vm156_vm3, %v1457_v12, %v3778_v34  ;;  %v1475_v14 = vsel %vm156_vm3, %v3963_v18, %v1467_v24 }
 0x235   :  { %v1491_v20 = vsel %vm156_vm3, %v1467_v24, %v3780_v26  ;;  %1595 = vst [vmem:[#allocation5 + $0x8] sm:$0xff] %v1571_v57  ;;  %1596 = vst [vmem:[#allocation5 + $0x10] sm:$0xff] %v1572_v52  ;;  %v1499_v6 = vsel %vm100_vm11, %v1398_v9, %v1470_v4  ;;  %v1500_v33 = vsel %vm101_vm12, %v1414_v48, %v1486_v49 }
 0x236   :  { %1610 = vst [vmem:[#allocation5 + $0x80] sm:$0xff] %v1586_v60  ;;  %1611 = vst [vmem:[#allocation5 + $0x88] sm:$0xff] %v1587_v17  ;;  %v1514_v34 = vsel %vm100_vm11, %v1403_v19, %v1475_v14  ;;  %v1515_v30 = vsel %vm101_vm12, %v1419_v63, %v1491_v20  ;;  %v1529_v18 = vsel %vm106_vm6, 1.0, %v1499_v6  ;;  %v1530_v26 = vsel %vm107_vm7, 1.0, %v1500_v33  ;;  %v4639_v19 = vld [vmem:[#allocation22_spill] sm:$0xff]  ;;  %v1720_v63 = vld [vmem:[#allocation2 + $0xa0] sm:$0xff] }
 0x237   :  { %v1544_v9 = vsel %vm106_vm6, 1.0, %v1514_v34  ;;  %v1545_v48 = vsel %vm107_vm7, 1.0, %v1515_v30  ;;  %v1577_v8 = vmul.f32 %v3732_v42, %v1529_v18  ;;  %v1578_v59 = vmul.f32 %v3878_v5, %v1530_v26  ;;  %v1461_v2 = vpop.permute.xlu0 %1460  ;;  %v4638_v5 = vld [vmem:[#allocation8_spill] sm:$0xff] }
 0x238   :  { %v1592_v55 = vmul.f32 %v3766_v50, %v1544_v9  ;;  %v1593_v3 = vmul.f32 %v3938_v32, %v1545_v48  ;;  %v1400_v16 = vsel %vm1395_vm2, %v4627_v11, %v4637_v38  ;;  %v1416_v31 = vsel %vm1395_vm2, %v4637_v38, %v4628_v25 }
 0x239   :  { %v1472_v42 = vsel %vm156_vm3, %v4012_v44, %v1461_v2  ;;  %v1488_v50 = vsel %vm156_vm3, %v1461_v2, %v3824_v22  ;;  %v1559_v32 = vmul.f32 %v4638_v5, %v3747_v62  ;;  %v1560_v61 = vmul.f32 %v4640_v27, %v4639_v19  ;;  %1601 = vst [vmem:[#allocation5 + $0x38] sm:$0xff] %v1577_v8  ;;  %v1719_v44 = vld [vmem:[#allocation2 + $0x98] sm:$0xff]  ;;  %v4642_v62 = vld [vmem:[#allocation16_spill] sm:$0xff] }
 0x23a   :  { %1602 = vst [vmem:[#allocation5 + $0x40] sm:$0xff] %v1578_v59  ;;  %v1505_v11 = vsel %vm100_vm11, %v1400_v16, %v1472_v42  ;;  %v1506_v25 = vsel %vm101_vm12, %v1416_v31, %v1488_v50  ;;  %1616 = vst [vmem:[#allocation5 + $0xb0] sm:$0xff] %v1592_v55  ;;  %v382_v22 = vsel %vm100_vm11, %v1719_v44, %v4641_v40 }
 0x23b   :  { %1617 = vst [vmem:[#allocation5 + $0xb8] sm:$0xff] %v1593_v3  ;;  %v383_v7 = vsel %vm101_vm12, %v1720_v63, %v4642_v62  ;;  %v1535_v41 = vsel %vm106_vm6, 1.0, %v1505_v11  ;;  %v1536_v10 = vsel %vm107_vm7, 1.0, %v1506_v25  ;;  %v1342_v35 = vsel %vm100_vm11, %v4644_v58, %v4643_v56  ;;  %v1465_v13 = vpop.permute.xlu0 %1464 }
 0x23c   :  { %v1583_v36 = vmul.f32 %v1559_v32, %v1535_v41  ;;  %v1584_v29 = vmul.f32 %v1560_v61, %v1536_v10  ;;  %v1402_v45 = vsel %vm1395_vm2, %v4629_v47, %v4645_v21  ;;  %v1418_v28 = vsel %vm1395_vm2, %v4645_v21, %v4630_v0 }
 0x23d   :  { %v1474_v53 = vsel %vm156_vm3, %v4052_v23, %v1465_v13  ;;  %v1490_v51 = vsel %vm156_vm3, %v1465_v13, %v3873_v15  ;;  %v1565_v1 = vmul.f32 %v1342_v35, %v382_v22  ;;  %v1566_v37 = vmul.f32 %v4646_v46, %v383_v7 }
 0x23e   :  { %1607 = vst [vmem:[#allocation5 + $0x68] sm:$0xff] %v1583_v36  ;;  %1608 = vst [vmem:[#allocation5 + $0x70] sm:$0xff] %v1584_v29  ;;  %v1511_v47 = vsel %vm100_vm11, %v1402_v45, %v1474_v53  ;;  %v1512_v0 = vsel %vm101_vm12, %v1418_v28, %v1490_v51 }
 0x23f   :  { %v1541_v23 = vsel %vm106_vm6, 1.0, %v1511_v47  ;;  %v1542_v54 = vsel %vm107_vm7, 1.0, %v1512_v0 }
 0x240   :  { %v1589_v15 = vmul.f32 %v1565_v1, %v1541_v23  ;;  %v1590_v57 = vmul.f32 %v1566_v37, %v1542_v54 }
 0x242   :  { %1613 = vst [vmem:[#allocation5 + $0x98] sm:$0xff] %v1589_v15  ;;  %1614 = vst [vmem:[#allocation5 + $0xa0] sm:$0xff] %v1590_v57 }
 0x243   :  { %1754 = shalt.err (!%p1751_p12)
}
 0x244   :  { %s1755_s28 = scalar_lea.hbm %s4236_s1, 3072 }
 0x245   :  { %p1756_p13 = scmp.ne.s32.totalorder %s4236_s1, %s1755_s28  ;;  %p1759_p0 = scmp.lt.u32.totalorder %s1755_s28, %s4236_s1 }
 0x247   :  { %p1761_p1 = pnand %p1759_p0, %p1756_p13 }
 0x249   :  { %1764 = shalt.err (!%p1761_p1)
}
 0x24a   :  { %1629 = dma.vmem_to_hbm [thread:$0]  %s1624_s24, 3072, %s4236_s1, [#allocation4], %s1770_s16, %s1770_s16, %s1771_s17  }
 0x24b   :  { %1767 = dma.done.wait [#allocation4], 3072  }
 0x24c   :  { %1768 = vsyncadd [#allocation4], 4294964224 }
 0x24d   :  { %1633 = vsyncpa [#allocation3], 1 }
 0x24e   :  { %1634 = vsyncpa [#allocation4], 1 }

</bundles_post_ra>
